<compile_context>
chip_gen: v7x
topology: tpu7x:2x2x1
jax: 0.10.0
libtpu: 0.0.40
codegen_flags: <defaults>
</compile_context>

<pallas_src>
import functools

import numpy as np
import jax
import jax.numpy as jnp
from jax.experimental import pallas as pl
from jax.experimental.pallas import tpu as pltpu


# ----------------------------------------------------------------------------
# Pallas kernel: per (batch, lk-tile) step, all heads: scores, joint softmax,
# fused Linear(2L->L), attn @ V.
# ----------------------------------------------------------------------------
def _mix_attn_kernel(scale, H, E, D,
                     q_ref, k_ref, qtf_lq_ref, qtf_lk_ref, v_ref,
                     mt_ref, mtf_ref, wt_ref, b_ref, o_ref):
    L = q_ref.shape[1]            # full lq length (resident side)
    q = q_ref[0]                  # (L, H*E)   bf16, lq side (resident)
    qtf_lq = qtf_lq_ref[0]        # (L, H*E)   bf16, lq side (resident)
    v = v_ref[0]                  # (L, H*D)   bf16 (resident)
    mt = mt_ref[0]                # (H, L)     f32 additive (0 / -inf) over lq
    mtf = mtf_ref[0]              # (H, L)     f32
    wt = wt_ref[...]              # (2L, L)    bf16 == transform W.T (resident)
    bias = b_ref[...]             # (1, L)     f32

    # Scale hoisted out of the head loop: one bf16 multiply per streamed tile.
    k_s = k_ref[0] * scale        # (TLK, H*E) bf16, lk tile
    t_s = qtf_lk_ref[0] * scale   # (TLK, H*E) bf16, lk tile

    dn = (((1,), (1,)), ((), ()))   # contract head-dim, no batch dims
    # Static unroll over heads: H is small and E/D = 8 so dynamic 8-lane-wide
    # slices buy nothing (masked sub-vreg loads either way); the lk tiling
    # already bounds the per-head f32 temporaries to (TLK, L).
    # TODO(synk): for configs with large H and lane-dense E/D (>=128), move the
    # head onto its own grid axis instead of this unroll.
    for h in range(H):
        e_sl = slice(h * E, (h + 1) * E)
        d_sl = slice(h * D, (h + 1) * D)

        # s[lk, lq] = scale * <.,.> + mask(lq); equals torch's scatter into a
        # -inf matrix followed by permute(0, 1, 3, 2).
        s_t = jax.lax.dot_general(k_s[:, e_sl], q[:, e_sl], dn,
                                  preferred_element_type=jnp.float32)
        s_t = s_t + mt[h:h + 1, :]
        s_tf = jax.lax.dot_general(t_s[:, e_sl], qtf_lq[:, e_sl], dn,
                                   preferred_element_type=jnp.float32)
        s_tf = s_tf + mtf[h:h + 1, :]

        # joint softmax over the concatenation [s_t, s_tf]
        m = jnp.maximum(jnp.max(s_t, axis=-1, keepdims=True),
                        jnp.max(s_tf, axis=-1, keepdims=True))
        e_t = jnp.exp(s_t - m)
        e_tf = jnp.exp(s_tf - m)
        inv = pl.reciprocal(jnp.sum(e_t, axis=-1, keepdims=True)
                            + jnp.sum(e_tf, axis=-1, keepdims=True),
                            approx=True)

        # Fused transform: one K=2L MXU pass against the full W.T; the 1/denom
        # row scaling is deferred past the matmul (commutes with it).
        e = jnp.concatenate([e_t.astype(wt.dtype), e_tf.astype(wt.dtype)],
                            axis=-1)                              # (TLK, 2L)
        acc = jnp.dot(e, wt, preferred_element_type=jnp.float32)  # (TLK, L)
        final = acc * inv + bias
        # TODO(synk): nn.Dropout(0.1) is identity in eval mode; not applied.

        # Direct per-head store into the output slab -- no concat slab.
        o_ref[0, :, d_sl] = jnp.dot(final.astype(v.dtype), v[:, d_sl],
                                    preferred_element_type=jnp.float32
                                    ).astype(o_ref.dtype)


# ----------------------------------------------------------------------------
# Wrapper: FFT amplitudes + top-k masks (JAX glue), reshapes, pallas_call
# ----------------------------------------------------------------------------
def mix_self_attention(tf_queries, queries, keys, values, mask, params,
                       factor=5, out_channels=8):
    del mask  # unused in the reference forward
    W, b = params["transform_w"], params["transform_b"]   # (L, 2L), (L,)
    B, L, H, E = queries.shape
    D = values.shape[-1]
    scale = 1.0 / np.sqrt(out_channels)

    n_top = min(int(factor * np.ceil(np.log(L))), L)

    bf16, f32 = jnp.bfloat16, jnp.float32
    # contiguous reshapes only -- no head-major HBM transposes
    q2 = queries.reshape(B, L, H * E).astype(bf16)
    k2 = keys.reshape(B, L, H * E).astype(bf16)
    qtf2 = tf_queries.reshape(B, L, H * E).astype(bf16)
    v2 = values.reshape(B, L, H * D).astype(bf16)

    # --- data-dependent top-k selection (plain JAX glue; FFT / top_k have no
    # clean Pallas equivalent).  Only the tiny (B, L, H) amplitude tensors are
    # ever permuted.
    q_f = jnp.fft.rfft(queries.astype(f32), axis=1)
    k_f = jnp.fft.rfft(keys.astype(f32), axis=1)
    autocorr = jnp.fft.irfft(q_f * jnp.conj(k_f), axis=1)        # (B, L, H, E)
    amp_t = jnp.transpose(jnp.linalg.norm(autocorr, axis=-1), (0, 2, 1))
    amp_tf = jnp.transpose(
        jnp.linalg.norm(tf_queries.astype(f32), axis=-1), (0, 2, 1))

    def topk_additive_mask(amp):                                 # (B, H, L)
        vals = jax.lax.top_k(amp, n_top)[0]
        thr = vals[..., n_top - 1:]            # n-th largest amplitude
        # TODO(synk): exact ties at the threshold unmask > n_top rows
        # (torch.topk keeps exactly n_top); measure-zero for float inputs.
        return jnp.where(amp >= thr, 0.0, -jnp.inf).astype(f32)

    mt = topk_additive_mask(amp_t)      # (B, H, L)
    mtf = topk_additive_mask(amp_tf)    # (B, H, L)

    wt = jnp.asarray(W, f32).T.astype(bf16)            # (2L, L) resident
    bias = jnp.asarray(b, f32).reshape(1, L)

    # lk / output-row tiling: stream k and the lk-side of tf_q per tile.
    TLK = 256 if (L > 256 and L % 256 == 0) else L
    n_lk = L // TLK

    # generation-aware VMEM limit (<= 85% of physical; >= 32 MiB)
    bpe16, bpe32 = 2, 4
    resident = ((L * H * E) * 2 * bpe16       # q + tf_q (lq side)
                + (L * H * D) * bpe16         # v
                + 2 * H * L * bpe32           # masks
                + 2 * L * L * bpe16           # W.T
                + L * bpe32)                  # bias
    streamed = (2 * (TLK * H * E) * bpe16     # k tile + tf_q lk tile
                + TLK * H * D * bpe16)        # output tile
    temps = H * 10 * TLK * L * bpe32          # unrolled per-head f32 temps
    need = 2 * resident + 2 * streamed + temps
    try:
        cap = int(getattr(pltpu.get_tpu_info(), "vmem_capacity_bytes",
                          64 * 1024 * 1024))
    except Exception:
        cap = 64 * 1024 * 1024                # conservative (v7x) fallback
    vmem_limit = int(min(int(0.85 * cap),
                         max(32 * 1024 * 1024, 2 * need)))

    kernel = functools.partial(_mix_attn_kernel, float(scale), H, E, D)
    out = pl.pallas_call(
        kernel,
        out_shape=jax.ShapeDtypeStruct((B, L, H * D), bf16),
        grid=(B, n_lk),
        in_specs=[
            pl.BlockSpec((1, L, H * E), lambda b, t: (b, 0, 0)),    # q (lq, resident)
            pl.BlockSpec((1, TLK, H * E), lambda b, t: (b, t, 0)),  # k (lk tile)
            pl.BlockSpec((1, L, H * E), lambda b, t: (b, 0, 0)),    # tf q (lq, resident)
            pl.BlockSpec((1, TLK, H * E), lambda b, t: (b, t, 0)),  # tf q (lk tile)
            pl.BlockSpec((1, L, H * D), lambda b, t: (b, 0, 0)),    # v (resident)
            pl.BlockSpec((1, H, L), lambda b, t: (b, 0, 0)),        # mask_t
            pl.BlockSpec((1, H, L), lambda b, t: (b, 0, 0)),        # mask_tf
            pl.BlockSpec((2 * L, L), lambda b, t: (0, 0)),          # W.T (resident)
            pl.BlockSpec((1, L), lambda b, t: (0, 0)),              # bias
        ],
        out_specs=pl.BlockSpec((1, TLK, H * D), lambda b, t: (b, t, 0)),
        compiler_params=pltpu.CompilerParams(
            dimension_semantics=("parallel", "parallel"),
            vmem_limit_bytes=vmem_limit),
    )(q2, k2, qtf2, qtf2, v2, mt, mtf, wt, bias)

    out = out.reshape(B, L, H, D)      # free reshape, no transpose
    return out, None


# ----------------------------------------------------------------------------
# Pure-JAX f32 reference mirroring the torch code (for correctness check)
# ----------------------------------------------------------------------------
def _get_sig_scores_ref(n, queries, keys, scale, corr=0):
    B, L_Q, H, E = queries.shape
    L_K = keys.shape[1]
    q = jnp.transpose(queries, (0, 2, 1, 3))
    k = jnp.transpose(keys, (0, 2, 1, 3))
    if corr:
        q_fft = jnp.fft.rfft(jnp.transpose(queries, (0, 2, 3, 1)), axis=-1)
        k_fft = jnp.fft.rfft(jnp.transpose(keys, (0, 2, 3, 1)), axis=-1)
        autocorr = jnp.transpose(
            jnp.fft.irfft(q_fft * jnp.conj(k_fft), axis=-1), (0, 1, 3, 2))
    else:
        autocorr = q
    amp = jnp.linalg.norm(autocorr, axis=-1)
    _, top_idx = jax.lax.top_k(amp, n)                      # (B, H, n)
    q_sel = jnp.take_along_axis(q, top_idx[..., None], axis=2)
    scores = jnp.einsum('bhnd,bhmd->bhnm', q_sel, k) * scale
    full = jnp.full((B, H, L_Q, L_K), -jnp.inf, dtype=queries.dtype)
    b_idx = jnp.arange(B)[:, None, None]
    h_idx = jnp.arange(H)[None, :, None]
    full = full.at[b_idx, h_idx, top_idx].set(scores)
    return jnp.transpose(full, (0, 1, 3, 2))


def _forward_ref(tf_queries, queries, keys, values, params, factor,
                 out_channels):
    B, L_Q, H, E = queries.shape
    scale = 1.0 / np.sqrt(out_channels)
    n_top = min(int(factor * np.ceil(np.log(L_Q))), L_Q)
    attn_t = _get_sig_scores_ref(n_top, queries, keys, scale, corr=1)
    attn_tf = _get_sig_scores_ref(n_top, tf_queries, tf_queries, scale, corr=0)
    concat = jnp.concatenate([attn_t, attn_tf], axis=-1)
    concat = jax.nn.softmax(concat, axis=-1)
    final = concat @ params["transform_w"].T + params["transform_b"]
    out = jnp.einsum('bhlm,bhmd->bhld', final,
                     jnp.transpose(values, (0, 2, 1, 3)))
    return jnp.transpose(out, (0, 2, 1, 3))


# ----------------------------------------------------------------------------
if __name__ == "__main__":
    B, L, H, E = 2, 16, 4, 8          # seq_len = 16, head dim E = D = 8
    out_channels = 8
    factor = 5

    key = jax.random.PRNGKey(0)
    k1, k2, k3, k4, k5, k6, k7 = jax.random.split(key, 7)

    tf_queries = jax.random.normal(k1, (B, L, H, E), jnp.float32)
    queries = jax.random.normal(k2, (B, L, H, E), jnp.float32)
    keys = jax.random.normal(k3, (B, L, H, E), jnp.float32)
    values = jax.random.normal(k4, (B, L, H, E), jnp.float32)

    # deterministic parameter init (nn.Linear(2L, L) style)
    bound = 1.0 / np.sqrt(2 * L)
    params = {
        "transform_w": jax.random.uniform(k5, (L, 2 * L), jnp.float32,
                                          -bound, bound),
        "transform_b": jax.random.uniform(k6, (L,), jnp.float32, -bound, bound),
        # self.weights = nn.Parameter(torch.rand(8, seq_len, 2)) -- unused fwd
        "weights": jax.random.uniform(k7, (8, L, 2), jnp.float32),
    }

    out, attn = mix_self_attention(tf_queries, queries, keys, values, None,
                                   params, factor=factor,
                                   out_channels=out_channels)
    out = jax.block_until_ready(out)

    ref = _forward_ref(tf_queries, queries, keys, values, params,
                       factor, out_channels)
    # tolerance relaxed vs f32: bf16 MXU operands (f32 accumulate), bf16
    # output, pre-scaled bf16 lk tiles and an approx EUP reciprocal.
    np.testing.assert_allclose(np.asarray(out.astype(jnp.float32)),
                               np.asarray(ref), rtol=4e-2, atol=4e-2)
    assert out.shape == (B, L, H, E)
    print("KERNEL_OK")
</pallas_src>

<mosaic_0001>
module attributes {stable_mosaic.version = 11 : i64} {
  func.func @_mix_attn_kernel(%arg0: i32, %arg1: i32, %arg2: memref<1x16x32xbf16, #tpu.memory_space<vmem>>, %arg3: memref<1x16x32xbf16, #tpu.memory_space<vmem>>, %arg4: memref<1x16x32xbf16, #tpu.memory_space<vmem>>, %arg5: memref<1x16x32xbf16, #tpu.memory_space<vmem>>, %arg6: memref<1x16x32xbf16, #tpu.memory_space<vmem>>, %arg7: memref<1x4x16xf32, #tpu.memory_space<vmem>>, %arg8: memref<1x4x16xf32, #tpu.memory_space<vmem>>, %arg9: memref<32x16xbf16, #tpu.memory_space<vmem>>, %arg10: memref<1x16xf32, #tpu.memory_space<vmem>>, %arg11: memref<1x16x32xbf16, #tpu.memory_space<vmem>>) attributes {dimension_semantics = [#tpu.dimension_semantics<parallel>, #tpu.dimension_semantics<parallel>], iteration_bounds = array<i64: 2, 1>, scalar_prefetch = 0 : i64, scratch_operands = 0 : i64, tpu.core_type = #tpu.core_type<tc>, window_params = [{transform_indices = @transform_0, window_bounds = array<i64: 1, 16, 32>}, {transform_indices = @transform_1, window_bounds = array<i64: 1, 16, 32>}, {transform_indices = @transform_2, window_bounds = array<i64: 1, 16, 32>}, {transform_indices = @transform_3, window_bounds = array<i64: 1, 16, 32>}, {transform_indices = @transform_4, window_bounds = array<i64: 1, 16, 32>}, {transform_indices = @transform_5, window_bounds = array<i64: 1, 4, 16>}, {transform_indices = @transform_6, window_bounds = array<i64: 1, 4, 16>}, {pipeline_mode = #tpu.pipeline_mode<synchronous>, transform_indices = @transform_7, window_bounds = array<i64: 32, 16>}, {pipeline_mode = #tpu.pipeline_mode<synchronous>, transform_indices = @transform_8, window_bounds = array<i64: 1, 16>}, {transform_indices = @transform_9, window_bounds = array<i64: 1, 16, 32>}]} {
    %c0 = arith.constant 0 : index
    %c0_0 = arith.constant 0 : index
    %c0_1 = arith.constant 0 : index
    %0 = vector.load %arg2[%c0, %c0_0, %c0_1] : memref<1x16x32xbf16, #tpu.memory_space<vmem>>, vector<1x16x32xbf16>
    %1 = vector.shape_cast %0 : vector<1x16x32xbf16> to vector<16x32xbf16>
    %c0_2 = arith.constant 0 : index
    %c0_3 = arith.constant 0 : index
    %c0_4 = arith.constant 0 : index
    %2 = vector.load %arg4[%c0_2, %c0_3, %c0_4] : memref<1x16x32xbf16, #tpu.memory_space<vmem>>, vector<1x16x32xbf16>
    %3 = vector.shape_cast %2 : vector<1x16x32xbf16> to vector<16x32xbf16>
    %c0_5 = arith.constant 0 : index
    %c0_6 = arith.constant 0 : index
    %c0_7 = arith.constant 0 : index
    %4 = vector.load %arg6[%c0_5, %c0_6, %c0_7] : memref<1x16x32xbf16, #tpu.memory_space<vmem>>, vector<1x16x32xbf16>
    %5 = vector.shape_cast %4 : vector<1x16x32xbf16> to vector<16x32xbf16>
    %c0_8 = arith.constant 0 : index
    %c0_9 = arith.constant 0 : index
    %c0_10 = arith.constant 0 : index
    %6 = vector.load %arg7[%c0_8, %c0_9, %c0_10] : memref<1x4x16xf32, #tpu.memory_space<vmem>>, vector<1x4x16xf32>
    %7 = vector.shape_cast %6 : vector<1x4x16xf32> to vector<4x16xf32>
    %c0_11 = arith.constant 0 : index
    %c0_12 = arith.constant 0 : index
    %c0_13 = arith.constant 0 : index
    %8 = vector.load %arg8[%c0_11, %c0_12, %c0_13] : memref<1x4x16xf32, #tpu.memory_space<vmem>>, vector<1x4x16xf32>
    %9 = vector.shape_cast %8 : vector<1x4x16xf32> to vector<4x16xf32>
    %c0_14 = arith.constant 0 : index
    %c0_15 = arith.constant 0 : index
    %10 = vector.load %arg9[%c0_14, %c0_15] : memref<32x16xbf16, #tpu.memory_space<vmem>>, vector<32x16xbf16>
    %c0_16 = arith.constant 0 : index
    %c0_17 = arith.constant 0 : index
    %11 = vector.load %arg10[%c0_16, %c0_17] : memref<1x16xf32, #tpu.memory_space<vmem>>, vector<1x16xf32>
    %c0_18 = arith.constant 0 : index
    %c0_19 = arith.constant 0 : index
    %c0_20 = arith.constant 0 : index
    %12 = vector.load %arg3[%c0_18, %c0_19, %c0_20] : memref<1x16x32xbf16, #tpu.memory_space<vmem>>, vector<1x16x32xbf16>
    %13 = vector.shape_cast %12 : vector<1x16x32xbf16> to vector<16x32xbf16>
    %cst = arith.constant 3.535160e-01 : bf16
    %14 = vector.broadcast %cst : bf16 to vector<16x32xbf16>
    %15 = arith.mulf %13, %14 : vector<16x32xbf16>
    %c0_21 = arith.constant 0 : index
    %c0_22 = arith.constant 0 : index
    %c0_23 = arith.constant 0 : index
    %16 = vector.load %arg5[%c0_21, %c0_22, %c0_23] : memref<1x16x32xbf16, #tpu.memory_space<vmem>>, vector<1x16x32xbf16>
    %17 = vector.shape_cast %16 : vector<1x16x32xbf16> to vector<16x32xbf16>
    %cst_24 = arith.constant 3.535160e-01 : bf16
    %18 = vector.broadcast %cst_24 : bf16 to vector<16x32xbf16>
    %19 = arith.mulf %17, %18 : vector<16x32xbf16>
    %20 = vector.extract_strided_slice %15 {offsets = [0, 0], sizes = [16, 8], strides = [1, 1]} : vector<16x32xbf16> to vector<16x8xbf16>
    %21 = vector.extract_strided_slice %1 {offsets = [0, 0], sizes = [16, 8], strides = [1, 1]} : vector<16x32xbf16> to vector<16x8xbf16>
    %cst_25 = arith.constant dense<0.000000e+00> : vector<16x16xf32>
    %22 = tpu.matmul %20, %21, %cst_25 {dimension_numbers = #tpu.dot_dimension_numbers<[1], [1], [0], [0], [0, 0, 1, 0], [], []>} : vector<16x8xbf16>, vector<16x8xbf16>, vector<16x16xf32> -> vector<16x16xf32>
    %23 = vector.extract_strided_slice %7 {offsets = [0, 0], sizes = [1, 16], strides = [1, 1]} : vector<4x16xf32> to vector<1x16xf32>
    %24 = vector.broadcast %23 : vector<1x16xf32> to vector<16x16xf32>
    %25 = arith.addf %22, %24 : vector<16x16xf32>
    %26 = vector.extract_strided_slice %19 {offsets = [0, 0], sizes = [16, 8], strides = [1, 1]} : vector<16x32xbf16> to vector<16x8xbf16>
    %27 = vector.extract_strided_slice %3 {offsets = [0, 0], sizes = [16, 8], strides = [1, 1]} : vector<16x32xbf16> to vector<16x8xbf16>
    %cst_26 = arith.constant dense<0.000000e+00> : vector<16x16xf32>
    %28 = tpu.matmul %26, %27, %cst_26 {dimension_numbers = #tpu.dot_dimension_numbers<[1], [1], [0], [0], [0, 0, 1, 0], [], []>} : vector<16x8xbf16>, vector<16x8xbf16>, vector<16x16xf32> -> vector<16x16xf32>
    %29 = vector.extract_strided_slice %9 {offsets = [0, 0], sizes = [1, 16], strides = [1, 1]} : vector<4x16xf32> to vector<1x16xf32>
    %30 = vector.broadcast %29 : vector<1x16xf32> to vector<16x16xf32>
    %31 = arith.addf %28, %30 : vector<16x16xf32>
    %cst_27 = arith.constant dense<0xFF800000> : vector<16xf32>
    %32 = vector.multi_reduction <maximumf>, %25, %cst_27 [1] : vector<16x16xf32> to vector<16xf32>
    %33 = vector.shape_cast %32 : vector<16xf32> to vector<16x1xf32>
    %cst_28 = arith.constant dense<0xFF800000> : vector<16xf32>
    %34 = vector.multi_reduction <maximumf>, %31, %cst_28 [1] : vector<16x16xf32> to vector<16xf32>
    %35 = vector.shape_cast %34 : vector<16xf32> to vector<16x1xf32>
    %36 = arith.maximumf %33, %35 : vector<16x1xf32>
    %37 = vector.broadcast %36 : vector<16x1xf32> to vector<16x16xf32>
    %38 = arith.subf %25, %37 : vector<16x16xf32>
    %39 = math.exp %38 : vector<16x16xf32>
    %40 = vector.broadcast %36 : vector<16x1xf32> to vector<16x16xf32>
    %41 = arith.subf %31, %40 : vector<16x16xf32>
    %42 = math.exp %41 : vector<16x16xf32>
    %cst_29 = arith.constant dense<0.000000e+00> : vector<16xf32>
    %43 = vector.multi_reduction <add>, %39, %cst_29 [1] : vector<16x16xf32> to vector<16xf32>
    %44 = vector.shape_cast %43 : vector<16xf32> to vector<16x1xf32>
    %cst_30 = arith.constant dense<0.000000e+00> : vector<16xf32>
    %45 = vector.multi_reduction <add>, %42, %cst_30 [1] : vector<16x16xf32> to vector<16xf32>
    %46 = vector.shape_cast %45 : vector<16xf32> to vector<16x1xf32>
    %47 = arith.addf %44, %46 : vector<16x1xf32>
    %48 = tpu.reciprocal %47 {approx = true} : vector<16x1xf32> -> vector<16x1xf32>
    %49 = arith.truncf %39 : vector<16x16xf32> to vector<16x16xbf16>
    %50 = arith.truncf %42 : vector<16x16xf32> to vector<16x16xbf16>
    %51 = tpu.concatenate %49, %50 in 1 : vector<16x16xbf16>, vector<16x16xbf16> -> vector<16x32xbf16>
    %cst_31 = arith.constant dense<0.000000e+00> : vector<16x16xf32>
    %52 = tpu.matmul %51, %10, %cst_31 {dimension_numbers = #tpu.dot_dimension_numbers<[1], [0], [0], [1], [0, 0, 1, 1], [], []>} : vector<16x32xbf16>, vector<32x16xbf16>, vector<16x16xf32> -> vector<16x16xf32>
    %53 = vector.broadcast %48 : vector<16x1xf32> to vector<16x16xf32>
    %54 = arith.mulf %52, %53 : vector<16x16xf32>
    %55 = vector.broadcast %11 : vector<1x16xf32> to vector<16x16xf32>
    %56 = arith.addf %54, %55 : vector<16x16xf32>
    %57 = arith.truncf %56 : vector<16x16xf32> to vector<16x16xbf16>
    %58 = vector.extract_strided_slice %5 {offsets = [0, 0], sizes = [16, 8], strides = [1, 1]} : vector<16x32xbf16> to vector<16x8xbf16>
    %cst_32 = arith.constant dense<0.000000e+00> : vector<16x8xf32>
    %59 = tpu.matmul %57, %58, %cst_32 {dimension_numbers = #tpu.dot_dimension_numbers<[1], [0], [0], [1], [0, 0, 1, 1], [], []>} : vector<16x16xbf16>, vector<16x8xbf16>, vector<16x8xf32> -> vector<16x8xf32>
    %60 = arith.truncf %59 : vector<16x8xf32> to vector<16x8xbf16>
    %c0_33 = arith.constant 0 : index
    %c0_34 = arith.constant 0 : index
    %c0_35 = arith.constant 0 : index
    %61 = vector.load %arg11[%c0_33, %c0_34, %c0_35] : memref<1x16x32xbf16, #tpu.memory_space<vmem>>, vector<1x16x8xbf16>
    %62 = vector.shape_cast %61 : vector<1x16x8xbf16> to vector<16x8xbf16>
    %63 = vector.shape_cast %60 : vector<16x8xbf16> to vector<1x16x8xbf16>
    tpu.vector_store %arg11[%c0_33, %c0_34, %c0_35], %63 {strides = array<i32>} : memref<1x16x32xbf16, #tpu.memory_space<vmem>>, vector<1x16x8xbf16>,
    %64 = vector.extract_strided_slice %15 {offsets = [0, 8], sizes = [16, 8], strides = [1, 1]} : vector<16x32xbf16> to vector<16x8xbf16>
    %65 = vector.extract_strided_slice %1 {offsets = [0, 8], sizes = [16, 8], strides = [1, 1]} : vector<16x32xbf16> to vector<16x8xbf16>
    %cst_36 = arith.constant dense<0.000000e+00> : vector<16x16xf32>
    %66 = tpu.matmul %64, %65, %cst_36 {dimension_numbers = #tpu.dot_dimension_numbers<[1], [1], [0], [0], [0, 0, 1, 0], [], []>} : vector<16x8xbf16>, vector<16x8xbf16>, vector<16x16xf32> -> vector<16x16xf32>
    %67 = vector.extract_strided_slice %7 {offsets = [1, 0], sizes = [1, 16], strides = [1, 1]} : vector<4x16xf32> to vector<1x16xf32>
    %68 = vector.broadcast %67 : vector<1x16xf32> to vector<16x16xf32>
    %69 = arith.addf %66, %68 : vector<16x16xf32>
    %70 = vector.extract_strided_slice %19 {offsets = [0, 8], sizes = [16, 8], strides = [1, 1]} : vector<16x32xbf16> to vector<16x8xbf16>
    %71 = vector.extract_strided_slice %3 {offsets = [0, 8], sizes = [16, 8], strides = [1, 1]} : vector<16x32xbf16> to vector<16x8xbf16>
    %cst_37 = arith.constant dense<0.000000e+00> : vector<16x16xf32>
    %72 = tpu.matmul %70, %71, %cst_37 {dimension_numbers = #tpu.dot_dimension_numbers<[1], [1], [0], [0], [0, 0, 1, 0], [], []>} : vector<16x8xbf16>, vector<16x8xbf16>, vector<16x16xf32> -> vector<16x16xf32>
    %73 = vector.extract_strided_slice %9 {offsets = [1, 0], sizes = [1, 16], strides = [1, 1]} : vector<4x16xf32> to vector<1x16xf32>
    %74 = vector.broadcast %73 : vector<1x16xf32> to vector<16x16xf32>
    %75 = arith.addf %72, %74 : vector<16x16xf32>
    %cst_38 = arith.constant dense<0xFF800000> : vector<16xf32>
    %76 = vector.multi_reduction <maximumf>, %69, %cst_38 [1] : vector<16x16xf32> to vector<16xf32>
    %77 = vector.shape_cast %76 : vector<16xf32> to vector<16x1xf32>
    %cst_39 = arith.constant dense<0xFF800000> : vector<16xf32>
    %78 = vector.multi_reduction <maximumf>, %75, %cst_39 [1] : vector<16x16xf32> to vector<16xf32>
    %79 = vector.shape_cast %78 : vector<16xf32> to vector<16x1xf32>
    %80 = arith.maximumf %77, %79 : vector<16x1xf32>
    %81 = vector.broadcast %80 : vector<16x1xf32> to vector<16x16xf32>
    %82 = arith.subf %69, %81 : vector<16x16xf32>
    %83 = math.exp %82 : vector<16x16xf32>
    %84 = vector.broadcast %80 : vector<16x1xf32> to vector<16x16xf32>
    %85 = arith.subf %75, %84 : vector<16x16xf32>
    %86 = math.exp %85 : vector<16x16xf32>
    %cst_40 = arith.constant dense<0.000000e+00> : vector<16xf32>
    %87 = vector.multi_reduction <add>, %83, %cst_40 [1] : vector<16x16xf32> to vector<16xf32>
    %88 = vector.shape_cast %87 : vector<16xf32> to vector<16x1xf32>
    %cst_41 = arith.constant dense<0.000000e+00> : vector<16xf32>
    %89 = vector.multi_reduction <add>, %86, %cst_41 [1] : vector<16x16xf32> to vector<16xf32>
    %90 = vector.shape_cast %89 : vector<16xf32> to vector<16x1xf32>
    %91 = arith.addf %88, %90 : vector<16x1xf32>
    %92 = tpu.reciprocal %91 {approx = true} : vector<16x1xf32> -> vector<16x1xf32>
    %93 = arith.truncf %83 : vector<16x16xf32> to vector<16x16xbf16>
    %94 = arith.truncf %86 : vector<16x16xf32> to vector<16x16xbf16>
    %95 = tpu.concatenate %93, %94 in 1 : vector<16x16xbf16>, vector<16x16xbf16> -> vector<16x32xbf16>
    %cst_42 = arith.constant dense<0.000000e+00> : vector<16x16xf32>
    %96 = tpu.matmul %95, %10, %cst_42 {dimension_numbers = #tpu.dot_dimension_numbers<[1], [0], [0], [1], [0, 0, 1, 1], [], []>} : vector<16x32xbf16>, vector<32x16xbf16>, vector<16x16xf32> -> vector<16x16xf32>
    %97 = vector.broadcast %92 : vector<16x1xf32> to vector<16x16xf32>
    %98 = arith.mulf %96, %97 : vector<16x16xf32>
    %99 = vector.broadcast %11 : vector<1x16xf32> to vector<16x16xf32>
    %100 = arith.addf %98, %99 : vector<16x16xf32>
    %101 = arith.truncf %100 : vector<16x16xf32> to vector<16x16xbf16>
    %102 = vector.extract_strided_slice %5 {offsets = [0, 8], sizes = [16, 8], strides = [1, 1]} : vector<16x32xbf16> to vector<16x8xbf16>
    %cst_43 = arith.constant dense<0.000000e+00> : vector<16x8xf32>
    %103 = tpu.matmul %101, %102, %cst_43 {dimension_numbers = #tpu.dot_dimension_numbers<[1], [0], [0], [1], [0, 0, 1, 1], [], []>} : vector<16x16xbf16>, vector<16x8xbf16>, vector<16x8xf32> -> vector<16x8xf32>
    %104 = arith.truncf %103 : vector<16x8xf32> to vector<16x8xbf16>
    %c0_44 = arith.constant 0 : index
    %c0_45 = arith.constant 0 : index
    %c8 = arith.constant 8 : index
    %105 = vector.load %arg11[%c0_44, %c0_45, %c8] : memref<1x16x32xbf16, #tpu.memory_space<vmem>>, vector<1x16x8xbf16>
    %106 = vector.shape_cast %105 : vector<1x16x8xbf16> to vector<16x8xbf16>
    %107 = vector.shape_cast %104 : vector<16x8xbf16> to vector<1x16x8xbf16>
    tpu.vector_store %arg11[%c0_44, %c0_45, %c8], %107 {strides = array<i32>} : memref<1x16x32xbf16, #tpu.memory_space<vmem>>, vector<1x16x8xbf16>,
    %108 = vector.extract_strided_slice %15 {offsets = [0, 16], sizes = [16, 8], strides = [1, 1]} : vector<16x32xbf16> to vector<16x8xbf16>
    %109 = vector.extract_strided_slice %1 {offsets = [0, 16], sizes = [16, 8], strides = [1, 1]} : vector<16x32xbf16> to vector<16x8xbf16>
    %cst_46 = arith.constant dense<0.000000e+00> : vector<16x16xf32>
    %110 = tpu.matmul %108, %109, %cst_46 {dimension_numbers = #tpu.dot_dimension_numbers<[1], [1], [0], [0], [0, 0, 1, 0], [], []>} : vector<16x8xbf16>, vector<16x8xbf16>, vector<16x16xf32> -> vector<16x16xf32>
    %111 = vector.extract_strided_slice %7 {offsets = [2, 0], sizes = [1, 16], strides = [1, 1]} : vector<4x16xf32> to vector<1x16xf32>
    %112 = vector.broadcast %111 : vector<1x16xf32> to vector<16x16xf32>
    %113 = arith.addf %110, %112 : vector<16x16xf32>
    %114 = vector.extract_strided_slice %19 {offsets = [0, 16], sizes = [16, 8], strides = [1, 1]} : vector<16x32xbf16> to vector<16x8xbf16>
    %115 = vector.extract_strided_slice %3 {offsets = [0, 16], sizes = [16, 8], strides = [1, 1]} : vector<16x32xbf16> to vector<16x8xbf16>
    %cst_47 = arith.constant dense<0.000000e+00> : vector<16x16xf32>
    %116 = tpu.matmul %114, %115, %cst_47 {dimension_numbers = #tpu.dot_dimension_numbers<[1], [1], [0], [0], [0, 0, 1, 0], [], []>} : vector<16x8xbf16>, vector<16x8xbf16>, vector<16x16xf32> -> vector<16x16xf32>
    %117 = vector.extract_strided_slice %9 {offsets = [2, 0], sizes = [1, 16], strides = [1, 1]} : vector<4x16xf32> to vector<1x16xf32>
    %118 = vector.broadcast %117 : vector<1x16xf32> to vector<16x16xf32>
    %119 = arith.addf %116, %118 : vector<16x16xf32>
    %cst_48 = arith.constant dense<0xFF800000> : vector<16xf32>
    %120 = vector.multi_reduction <maximumf>, %113, %cst_48 [1] : vector<16x16xf32> to vector<16xf32>
    %121 = vector.shape_cast %120 : vector<16xf32> to vector<16x1xf32>
    %cst_49 = arith.constant dense<0xFF800000> : vector<16xf32>
    %122 = vector.multi_reduction <maximumf>, %119, %cst_49 [1] : vector<16x16xf32> to vector<16xf32>
    %123 = vector.shape_cast %122 : vector<16xf32> to vector<16x1xf32>
    %124 = arith.maximumf %121, %123 : vector<16x1xf32>
    %125 = vector.broadcast %124 : vector<16x1xf32> to vector<16x16xf32>
    %126 = arith.subf %113, %125 : vector<16x16xf32>
    %127 = math.exp %126 : vector<16x16xf32>
    %128 = vector.broadcast %124 : vector<16x1xf32> to vector<16x16xf32>
    %129 = arith.subf %119, %128 : vector<16x16xf32>
    %130 = math.exp %129 : vector<16x16xf32>
    %cst_50 = arith.constant dense<0.000000e+00> : vector<16xf32>
    %131 = vector.multi_reduction <add>, %127, %cst_50 [1] : vector<16x16xf32> to vector<16xf32>
    %132 = vector.shape_cast %131 : vector<16xf32> to vector<16x1xf32>
    %cst_51 = arith.constant dense<0.000000e+00> : vector<16xf32>
    %133 = vector.multi_reduction <add>, %130, %cst_51 [1] : vector<16x16xf32> to vector<16xf32>
    %134 = vector.shape_cast %133 : vector<16xf32> to vector<16x1xf32>
    %135 = arith.addf %132, %134 : vector<16x1xf32>
    %136 = tpu.reciprocal %135 {approx = true} : vector<16x1xf32> -> vector<16x1xf32>
    %137 = arith.truncf %127 : vector<16x16xf32> to vector<16x16xbf16>
    %138 = arith.truncf %130 : vector<16x16xf32> to vector<16x16xbf16>
    %139 = tpu.concatenate %137, %138 in 1 : vector<16x16xbf16>, vector<16x16xbf16> -> vector<16x32xbf16>
    %cst_52 = arith.constant dense<0.000000e+00> : vector<16x16xf32>
    %140 = tpu.matmul %139, %10, %cst_52 {dimension_numbers = #tpu.dot_dimension_numbers<[1], [0], [0], [1], [0, 0, 1, 1], [], []>} : vector<16x32xbf16>, vector<32x16xbf16>, vector<16x16xf32> -> vector<16x16xf32>
    %141 = vector.broadcast %136 : vector<16x1xf32> to vector<16x16xf32>
    %142 = arith.mulf %140, %141 : vector<16x16xf32>
    %143 = vector.broadcast %11 : vector<1x16xf32> to vector<16x16xf32>
    %144 = arith.addf %142, %143 : vector<16x16xf32>
    %145 = arith.truncf %144 : vector<16x16xf32> to vector<16x16xbf16>
    %146 = vector.extract_strided_slice %5 {offsets = [0, 16], sizes = [16, 8], strides = [1, 1]} : vector<16x32xbf16> to vector<16x8xbf16>
    %cst_53 = arith.constant dense<0.000000e+00> : vector<16x8xf32>
    %147 = tpu.matmul %145, %146, %cst_53 {dimension_numbers = #tpu.dot_dimension_numbers<[1], [0], [0], [1], [0, 0, 1, 1], [], []>} : vector<16x16xbf16>, vector<16x8xbf16>, vector<16x8xf32> -> vector<16x8xf32>
    %148 = arith.truncf %147 : vector<16x8xf32> to vector<16x8xbf16>
    %c0_54 = arith.constant 0 : index
    %c0_55 = arith.constant 0 : index
    %c16 = arith.constant 16 : index
    %149 = vector.load %arg11[%c0_54, %c0_55, %c16] : memref<1x16x32xbf16, #tpu.memory_space<vmem>>, vector<1x16x8xbf16>
    %150 = vector.shape_cast %149 : vector<1x16x8xbf16> to vector<16x8xbf16>
    %151 = vector.shape_cast %148 : vector<16x8xbf16> to vector<1x16x8xbf16>
    tpu.vector_store %arg11[%c0_54, %c0_55, %c16], %151 {strides = array<i32>} : memref<1x16x32xbf16, #tpu.memory_space<vmem>>, vector<1x16x8xbf16>,
    %152 = vector.extract_strided_slice %15 {offsets = [0, 24], sizes = [16, 8], strides = [1, 1]} : vector<16x32xbf16> to vector<16x8xbf16>
    %153 = vector.extract_strided_slice %1 {offsets = [0, 24], sizes = [16, 8], strides = [1, 1]} : vector<16x32xbf16> to vector<16x8xbf16>
    %cst_56 = arith.constant dense<0.000000e+00> : vector<16x16xf32>
    %154 = tpu.matmul %152, %153, %cst_56 {dimension_numbers = #tpu.dot_dimension_numbers<[1], [1], [0], [0], [0, 0, 1, 0], [], []>} : vector<16x8xbf16>, vector<16x8xbf16>, vector<16x16xf32> -> vector<16x16xf32>
    %155 = vector.extract_strided_slice %7 {offsets = [3, 0], sizes = [1, 16], strides = [1, 1]} : vector<4x16xf32> to vector<1x16xf32>
    %156 = vector.broadcast %155 : vector<1x16xf32> to vector<16x16xf32>
    %157 = arith.addf %154, %156 : vector<16x16xf32>
    %158 = vector.extract_strided_slice %19 {offsets = [0, 24], sizes = [16, 8], strides = [1, 1]} : vector<16x32xbf16> to vector<16x8xbf16>
    %159 = vector.extract_strided_slice %3 {offsets = [0, 24], sizes = [16, 8], strides = [1, 1]} : vector<16x32xbf16> to vector<16x8xbf16>
    %cst_57 = arith.constant dense<0.000000e+00> : vector<16x16xf32>
    %160 = tpu.matmul %158, %159, %cst_57 {dimension_numbers = #tpu.dot_dimension_numbers<[1], [1], [0], [0], [0, 0, 1, 0], [], []>} : vector<16x8xbf16>, vector<16x8xbf16>, vector<16x16xf32> -> vector<16x16xf32>
    %161 = vector.extract_strided_slice %9 {offsets = [3, 0], sizes = [1, 16], strides = [1, 1]} : vector<4x16xf32> to vector<1x16xf32>
    %162 = vector.broadcast %161 : vector<1x16xf32> to vector<16x16xf32>
    %163 = arith.addf %160, %162 : vector<16x16xf32>
    %cst_58 = arith.constant dense<0xFF800000> : vector<16xf32>
    %164 = vector.multi_reduction <maximumf>, %157, %cst_58 [1] : vector<16x16xf32> to vector<16xf32>
    %165 = vector.shape_cast %164 : vector<16xf32> to vector<16x1xf32>
    %cst_59 = arith.constant dense<0xFF800000> : vector<16xf32>
    %166 = vector.multi_reduction <maximumf>, %163, %cst_59 [1] : vector<16x16xf32> to vector<16xf32>
    %167 = vector.shape_cast %166 : vector<16xf32> to vector<16x1xf32>
    %168 = arith.maximumf %165, %167 : vector<16x1xf32>
    %169 = vector.broadcast %168 : vector<16x1xf32> to vector<16x16xf32>
    %170 = arith.subf %157, %169 : vector<16x16xf32>
    %171 = math.exp %170 : vector<16x16xf32>
    %172 = vector.broadcast %168 : vector<16x1xf32> to vector<16x16xf32>
    %173 = arith.subf %163, %172 : vector<16x16xf32>
    %174 = math.exp %173 : vector<16x16xf32>
    %cst_60 = arith.constant dense<0.000000e+00> : vector<16xf32>
    %175 = vector.multi_reduction <add>, %171, %cst_60 [1] : vector<16x16xf32> to vector<16xf32>
    %176 = vector.shape_cast %175 : vector<16xf32> to vector<16x1xf32>
    %cst_61 = arith.constant dense<0.000000e+00> : vector<16xf32>
    %177 = vector.multi_reduction <add>, %174, %cst_61 [1] : vector<16x16xf32> to vector<16xf32>
    %178 = vector.shape_cast %177 : vector<16xf32> to vector<16x1xf32>
    %179 = arith.addf %176, %178 : vector<16x1xf32>
    %180 = tpu.reciprocal %179 {approx = true} : vector<16x1xf32> -> vector<16x1xf32>
    %181 = arith.truncf %171 : vector<16x16xf32> to vector<16x16xbf16>
    %182 = arith.truncf %174 : vector<16x16xf32> to vector<16x16xbf16>
    %183 = tpu.concatenate %181, %182 in 1 : vector<16x16xbf16>, vector<16x16xbf16> -> vector<16x32xbf16>
    %cst_62 = arith.constant dense<0.000000e+00> : vector<16x16xf32>
    %184 = tpu.matmul %183, %10, %cst_62 {dimension_numbers = #tpu.dot_dimension_numbers<[1], [0], [0], [1], [0, 0, 1, 1], [], []>} : vector<16x32xbf16>, vector<32x16xbf16>, vector<16x16xf32> -> vector<16x16xf32>
    %185 = vector.broadcast %180 : vector<16x1xf32> to vector<16x16xf32>
    %186 = arith.mulf %184, %185 : vector<16x16xf32>
    %187 = vector.broadcast %11 : vector<1x16xf32> to vector<16x16xf32>
    %188 = arith.addf %186, %187 : vector<16x16xf32>
    %189 = arith.truncf %188 : vector<16x16xf32> to vector<16x16xbf16>
    %190 = vector.extract_strided_slice %5 {offsets = [0, 24], sizes = [16, 8], strides = [1, 1]} : vector<16x32xbf16> to vector<16x8xbf16>
    %cst_63 = arith.constant dense<0.000000e+00> : vector<16x8xf32>
    %191 = tpu.matmul %189, %190, %cst_63 {dimension_numbers = #tpu.dot_dimension_numbers<[1], [0], [0], [1], [0, 0, 1, 1], [], []>} : vector<16x16xbf16>, vector<16x8xbf16>, vector<16x8xf32> -> vector<16x8xf32>
    %192 = arith.truncf %191 : vector<16x8xf32> to vector<16x8xbf16>
    %c0_64 = arith.constant 0 : index
    %c0_65 = arith.constant 0 : index
    %c24 = arith.constant 24 : index
    %193 = vector.load %arg11[%c0_64, %c0_65, %c24] : memref<1x16x32xbf16, #tpu.memory_space<vmem>>, vector<1x16x8xbf16>
    %194 = vector.shape_cast %193 : vector<1x16x8xbf16> to vector<16x8xbf16>
    %195 = vector.shape_cast %192 : vector<16x8xbf16> to vector<1x16x8xbf16>
    tpu.vector_store %arg11[%c0_64, %c0_65, %c24], %195 {strides = array<i32>} : memref<1x16x32xbf16, #tpu.memory_space<vmem>>, vector<1x16x8xbf16>,
    return
  }
  func.func @transform_0(%arg0: i32, %arg1: i32) -> (i32, i32, i32) {
    %c0_i32 = arith.constant 0 : i32
    %c0_i32_0 = arith.constant 0 : i32
    %c0_i32_1 = arith.constant 0 : i32
    return %arg0, %c0_i32, %c0_i32_0 : i32, i32, i32
  }
  func.func @transform_1(%arg0: i32, %arg1: i32) -> (i32, i32, i32) {
    %c0_i32 = arith.constant 0 : i32
    %c0_i32_0 = arith.constant 0 : i32
    return %arg0, %arg1, %c0_i32 : i32, i32, i32
  }
  func.func @transform_2(%arg0: i32, %arg1: i32) -> (i32, i32, i32) {
    %c0_i32 = arith.constant 0 : i32
    %c0_i32_0 = arith.constant 0 : i32
    %c0_i32_1 = arith.constant 0 : i32
    return %arg0, %c0_i32, %c0_i32_0 : i32, i32, i32
  }
  func.func @transform_3(%arg0: i32, %arg1: i32) -> (i32, i32, i32) {
    %c0_i32 = arith.constant 0 : i32
    %c0_i32_0 = arith.constant 0 : i32
    return %arg0, %arg1, %c0_i32 : i32, i32, i32
  }
  func.func @transform_4(%arg0: i32, %arg1: i32) -> (i32, i32, i32) {
    %c0_i32 = arith.constant 0 : i32
    %c0_i32_0 = arith.constant 0 : i32
    %c0_i32_1 = arith.constant 0 : i32
    return %arg0, %c0_i32, %c0_i32_0 : i32, i32, i32
  }
  func.func @transform_5(%arg0: i32, %arg1: i32) -> (i32, i32, i32) {
    %c0_i32 = arith.constant 0 : i32
    %c0_i32_0 = arith.constant 0 : i32
    %c0_i32_1 = arith.constant 0 : i32
    return %arg0, %c0_i32, %c0_i32_0 : i32, i32, i32
  }
  func.func @transform_6(%arg0: i32, %arg1: i32) -> (i32, i32, i32) {
    %c0_i32 = arith.constant 0 : i32
    %c0_i32_0 = arith.constant 0 : i32
    %c0_i32_1 = arith.constant 0 : i32
    return %arg0, %c0_i32, %c0_i32_0 : i32, i32, i32
  }
  func.func @transform_7(%arg0: i32, %arg1: i32) -> (i32, i32) {
    %c0_i32 = arith.constant 0 : i32
    %c0_i32_0 = arith.constant 0 : i32
    %c0_i32_1 = arith.constant 0 : i32
    return %c0_i32, %c0_i32_0 : i32, i32
  }
  func.func @transform_8(%arg0: i32, %arg1: i32) -> (i32, i32) {
    %c0_i32 = arith.constant 0 : i32
    %c0_i32_0 = arith.constant 0 : i32
    %c0_i32_1 = arith.constant 0 : i32
    return %c0_i32, %c0_i32_0 : i32, i32
  }
  func.func @transform_9(%arg0: i32, %arg1: i32) -> (i32, i32, i32) {
    %c0_i32 = arith.constant 0 : i32
    %c0_i32_0 = arith.constant 0 : i32
    return %arg0, %arg1, %c0_i32 : i32, i32, i32
  }
}

</mosaic_0001>

<bundles_post_ra>
// kernel: tpu_custom_call.1
= control target key start
LH: loop header
LB: loop body
LE: loop exit
PB: predicated region body
PF: predicated region fallthrough
CT: control target
= control target key end

     0   :  { %s3210_s0 = inlined_call_operand.vmem [shape: bf16[2,16,32], index: 0, kind: input, shape index: {}]   ;;  %s3211_s1 = inlined_call_operand.hbm [shape: bf16[2,16,32], index: 1, kind: input, shape index: {}]   ;;  %s3212_s2 = inlined_call_operand.hbm [shape: bf16[2,16,32], index: 2, kind: input, shape index: {}]   ;;  %s3213_s3 = inlined_call_operand.vmem [shape: bf16[2,16,32], index: 3, kind: input, shape index: {}]   ;;  %s3214_s4 = inlined_call_operand.hbm [shape: bf16[2,16,32], index: 4, kind: input, shape index: {}]   ;;  %s3215_s5 = inlined_call_operand.hbm [shape: f32[2,4,16], index: 5, kind: input, shape index: {}]   ;;  %s3216_s6 = inlined_call_operand.hbm [shape: f32[2,4,16], index: 6, kind: input, shape index: {}]   ;;  %s3217_s7 = inlined_call_operand.vmem [shape: bf16[32,16], index: 7, kind: input, shape index: {}]   ;;  %s3218_s8 = inlined_call_operand.vmem [shape: f32[1,16], index: 8, kind: input, shape index: {}]   ;;  %s3219_s9 = inlined_call_operand.hbm [shape: bf16[2,16,32], index: 9, kind: output, shape index: {}]  }
   0x1   :  { %3238 = sst [smem:[#allocation23_spill]] %s3211_s1 }
   0x2   :  { %3239 = sst [smem:[#allocation24_spill]] %s3212_s2 }
   0x3   :  { %3240 = sst [smem:[#allocation25_spill]] %s3213_s3 }
   0x4   :  { %3241 = sst [smem:[#allocation26_spill]] %s3215_s5 }
   0x5   :  { %3242 = sst [smem:[#allocation27_spill]] %s3217_s7 }
   0x6   :  { %3243 = sst [smem:[#allocation28_spill]] %s3218_s8 }
   0x7   :  { %3244 = sst [smem:[#allocation29_spill]] %s3219_s9 }
   0x8   :  { %14 = vsyncpa [#allocation3], 0 }
   0x9   :  { %16 = vsyncpa [#allocation3 + $0x1], 0 }
   0xa   :  { %17 = vsyncpa [#allocation6], 0 }
   0xb   :  { %19 = vsyncpa [#allocation6 + $0x1], 0 }
   0xc   :  { %20 = vsyncpa [#allocation9], 0 }
   0xd   :  { %22 = vsyncpa [#allocation9 + $0x1], 0 }
   0xe   :  { %23 = vsyncpa [#allocation4], 0 }
   0xf   :  { %25 = vsyncpa [#allocation4 + $0x1], 0  ;;  %s2605_s30 = smov 0   ;;  %s2607_s10 = smov 0  }
  0x10   :  { %s2609_s11 = smov 0   ;;  %s2611_s12 = smov 0  }
  0x11   :  { %s2613_s13 = smov 0   ;;  %s2615_s14 = smov 0  }
  0x12 LB: > { %3245 = sst [smem:[#allocation16_spill]] %s2515_s30  ;;  %s2636_s15 = sadd.s32 4294967295, %s2535_s14   ;;  %s2535_s14 = sphi %s2615_s14, %s31_s14   ;;  %s2531_s13 = sphi %s2613_s13, %s3284_s13   ;;  %s2527_s12 = sphi %s2611_s12, %s3283_s12   ;;  %s2523_s11 = sphi %s2609_s11, %s3282_s11   ;;  %s2519_s10 = sphi %s2607_s10, %s3286_s10   ;;  %s2515_s30 = sphi %s2605_s30, %s3285_s30  }
  0x13   : > { %3246 = sst [smem:[#allocation17_spill]] %s2523_s11  ;;  %s1930_s16 = sadd.s32 4294967294, %s2535_s14  }
  0x14   : > { %3247 = sst [smem:[#allocation18_spill]] %s2531_s13  ;;  %s43_s17 = sadd.s32 1, %s2531_s13 }
  0x15   : > { %s78_s18 = sadd.s32 1, %s2523_s11  ;;  %p45_p0 = scmp.ge.s32.totalorder %s43_s17, 2 }
  0x16   : > { %p85_p1 = scmp.ne.s32.totalorder %s2523_s11, %s2519_s10  ;;  %p86_p2 = scmp.eq.s32.totalorder %s2535_s14, 0 }
  0x17   : > { %p91_p3 = scmp.ne.s32.totalorder %s2519_s10, %s2515_s30  ;;  %s3288_s17 = smov (%p45_p0, %s43_s17), 0 }
  0x18   : > { %3248 = sst [smem:[#allocation19_spill]] %s3288_s17  ;;  %p2648_p4 = por %p86_p2, %p85_p1 }
  0x19   : > { %p92_p5 = scmp.eq.s32.totalorder %s2636_s15, 0  ;;  %s73_s20 = ssub.s32 %s2531_s13, %s3288_s17 }
  0x1a   : > { %p291_p6 = scmp.eq.s32.totalorder %s2636_s15, 1  ;;  %p76_p7 = scmp.eq.s32.totalorder %s73_s20, 0 }
  0x1b   : > { %p2656_p8 = por %p92_p5, %p91_p3  ;;  %p297_p10 = scmp.eq.s32.totalorder %s1930_s16, 1 }
  0x1c   : > { %p2660_p9 = por %p291_p6, %p85_p1  ;;  %p2180_p13 = scmp.lt.s32.totalorder %s2535_s14, 2 }
  0x1d   : > { %s3250_s21 = scalar_select %p2656_p8, 1, 0 }
  0x1e   : > { %s3251_s22 = scalar_select %p2660_p9, 1, 0 }
  0x1f   : > { %s2665_s23 = scalar_select %p76_p7, %s2523_s11, %s78_s18  }
  0x20   : > { %3252 = sst [smem:[#allocation20_spill]] %s3251_s22  ;;  %p2667_p11 = por %p297_p10, %p91_p3 }
  0x21   : > { %3253 = sst [smem:[#allocation21_spill]] %s2665_s23  ;;  %s2674_s25 = sand.u32 1, %s2523_s11  }
  0x22   : > { %s3254_s24 = scalar_select %p2667_p11, 1, 0 }
  0x23   : > { %s2677_s26 = sshll.u32 %s2674_s25, 3  ;;  %s2680_s27 = sshll.u32 %s2531_s13, 7 }
  0x24   : > { %3255 = sst [smem:[#allocation22_spill]] %s3254_s24  ;;  %p2684_p0 = pnand %p2180_p13, %p2648_p4 }
  0x25   : > { %s3225_s29 = sand.u32 1, %s2535_s14   ;;  %s3257_s2 = sld [smem:[#allocation24_spill]] }
  0x26   : > { %s3256_s28 = scalar_select %p2684_p0, 1, 0 }
  0x27   : > { %s358_s17 = scalar_lea.vmem [#allocation5], %s2677_s26  ;;  %s2702_s19 = scalar_lea.sflag [#allocation6], %s3225_s29 }
  0x28   : > { %s365_s23 = sshll.u32 %s358_s17, 4  ;;  %p2708_p4 = pneg %p2684_p0  ;;  %s2697_s23 = int_to_ptr.vmem [resolvable:$true] %s365_s23 }
  0x2b   : > { %s2693_s20 = scalar_lea.hbm %s3257_s2, %s2680_s27  ;;  %s2300_s24 = scalar_lea.hbm %s3257_s2, 256 }
  0x2c   : > { %s2295_s11 = scalar_lea.hbm %s2693_s20, 128  ;;  %p2301_p7 = scmp.lt.u32.totalorder %s2693_s20, %s3257_s2 }
  0x2d   : > { %p2296_p3 = scmp.ne.s32.totalorder %s2693_s20, %s2295_s11  ;;  %p2302_p10 = scmp.lt.u32.totalorder %s2300_s24, %s2295_s11 }
  0x2e   : > { %p2304_p12 = scmp.lt.u32.totalorder %s2295_s11, %s2693_s20 }
  0x2f   : > { %p2298_p5 = pnand %p2708_p4, %p2296_p3  ;;  %p2303_p13 = por %p2302_p10, %p2301_p7 }
  0x31   : > { %p2299_p6 = pneg %p2298_p5  ;;  %p2305_p1 = por %p2304_p12, %p2303_p13 }
  0x33   : > { %p2306_p2 = pnand %p2305_p1, %p2299_p6 }
  0x35   : > { %2309 = shalt.err (!%p2306_p2)
}
  0x36   : > { %s2310_s29 = scalar_lea.vmem %s2697_s23, 128  ;;  %s2537_s18 = smov [#allocation5]  }
  0x37   : > { %p2311_p3 = scmp.ne.s32.totalorder %s2697_s23, %s2310_s29  ;;  %s2315_s17 = sshll.u32 %s2537_s18, 4  ;;  %s2316_s17 = int_to_ptr.vmem [resolvable:$false] %s2315_s17 }
  0x38   : > { %s2317_s9 = scalar_lea.vmem %s2316_s17, 256  ;;  %p2318_p9 = scmp.lt.s32.totalorder %s2697_s23, %s2316_s17 }
  0x39   : > { %p2313_p5 = pnand %p2311_p3, %p2708_p4  ;;  %p2319_p8 = scmp.lt.s32.totalorder %s2317_s9, %s2310_s29 }
  0x3b   : > { %p2314_p11 = pneg %p2313_p5  ;;  %p2320_p7 = por %p2319_p8, %p2318_p9 }
  0x3d   : > { %p2321_p10 = pnand %p2320_p7, %p2314_p11 }
  0x3f   : > { %2324 = shalt.err (!%p2321_p10)
}
  0x40   : > { %s3230_s30 = smov 64   ;;  %s3232_s11 = smov 4  }
  0x41   : > { %2166 = dma.hbm_to_vmem [thread:$0]  (!%p2684_p0), %s2693_s20, 128, %s2697_s23, %s2702_s19, %s3230_s30, %s3230_s30, %s3232_s11  }
  0x42   : > { %p3259_p8 = scmp.lt.s32.totalorder %s2535_s14, 3  ;;  %p3260_p9 = scmp.ge.s32.totalorder %s2535_s14, 1 }
  0x43   : > { %s3236_s29 = sshll.u32 %s2674_s25, 2  ;;  %s1943_s18 = sshll.u32 %s2531_s13, 6 }
  0x44   : > { %p2739_p11 = pnand %p3260_p9, %p3259_p8  ;;  %s3262_s5 = sld [smem:[#allocation26_spill]] }
  0x45   : > { %s413_s22 = scalar_lea.vmem [#allocation8], %s3236_s29  ;;  %s2757_s11 = scalar_lea.hbm %s3216_s6, %s1943_s18 }
  0x46   : > { %s3261_s24 = scalar_select %p2739_p11, 1, 0 }
  0x47   : > { %s420_s23 = sshll.u32 %s413_s22, 4  ;;  %s3263_s13 = sand.u32 1, %s2535_s14   ;;  %s2752_s23 = int_to_ptr.vmem [resolvable:$true] %s420_s23 }
  0x48   : > { %s2761_s8 = scalar_lea.sflag [#allocation9], %s3263_s13 }
  0x4a   : > { %s2748_s2 = scalar_lea.hbm %s3262_s5, %s1943_s18  ;;  %s2330_s29 = scalar_lea.hbm %s3262_s5, 128 }
  0x4b   : > { %s2325_s17 = scalar_lea.hbm %s2748_s2, 64  ;;  %p2331_p6 = scmp.lt.u32.totalorder %s2748_s2, %s3262_s5 }
  0x4c   : > { %p2326_p12 = scmp.ne.s32.totalorder %s2748_s2, %s2325_s17  ;;  %p2332_p13 = scmp.lt.u32.totalorder %s2330_s29, %s2325_s17 }
  0x4d   : > { %p2334_p5 = scmp.lt.u32.totalorder %s2325_s17, %s2748_s2 }
  0x4e   : > { %p2328_p1 = pnand %p2326_p12, %p2708_p4  ;;  %p2333_p3 = por %p2332_p13, %p2331_p6 }
  0x50   : > { %p2329_p2 = pneg %p2328_p1  ;;  %p2335_p7 = por %p2334_p5, %p2333_p3 }
  0x52   : > { %p2336_p10 = pnand %p2335_p7, %p2329_p2 }
  0x54   : > { %2339 = shalt.err (!%p2336_p10)
}
  0x55   : > { %s2340_s13 = scalar_lea.vmem %s2752_s23, 64  ;;  %s2540_s7 = smov [#allocation8]  }
  0x56   : > { %p2341_p8 = scmp.ne.s32.totalorder %s2752_s23, %s2340_s13  ;;  %s2345_s30 = sshll.u32 %s2540_s7, 4  ;;  %s2346_s30 = int_to_ptr.vmem [resolvable:$false] %s2345_s30 }
  0x57   : > { %s2347_s3 = scalar_lea.vmem %s2346_s30, 128  ;;  %p2348_p1 = scmp.lt.s32.totalorder %s2752_s23, %s2346_s30 }
  0x58   : > { %p2343_p9 = pnand %p2341_p8, %p2708_p4  ;;  %p2349_p11 = scmp.lt.s32.totalorder %s2347_s3, %s2340_s13 }
  0x5a   : > { %p2344_p12 = pneg %p2343_p9  ;;  %p2350_p6 = por %p2349_p11, %p2348_p1 }
  0x5c   : > { %p2351_p13 = pnand %p2350_p6, %p2344_p12 }
  0x5e   : > { %2354 = shalt.err (!%p2351_p13)
}
  0x5f   : > { %2172 = dma.hbm_to_vmem [thread:$0]  (!%p2684_p0), %s2748_s2, 64, %s2752_s23, %s2761_s8  }
  0x60   : > { %s3264_s1 = sld [smem:[#allocation23_spill]]  ;;  %s335_s17 = scalar_lea.vmem [#allocation2], %s2677_s26 }
  0x61   : > { %s344_s9 = sshll.u32 %s335_s17, 4  ;;  %s332_s22 = scalar_lea.sflag [#allocation3], %s2674_s25  ;;  %s2792_s9 = int_to_ptr.vmem [resolvable:$true] %s344_s9 }
  0x66   : > { %s2789_s20 = scalar_lea.hbm %s3264_s1, %s2680_s27  ;;  %s2360_s7 = scalar_lea.hbm %s3264_s1, 256 }
  0x67   : > { %s2355_s13 = scalar_lea.hbm %s2789_s20, 128  ;;  %p2361_p5 = scmp.lt.u32.totalorder %s2789_s20, %s3264_s1 }
  0x68   : > { %p2356_p11 = scmp.ne.s32.totalorder %s2789_s20, %s2355_s13  ;;  %p2362_p7 = scmp.lt.u32.totalorder %s2360_s7, %s2355_s13 }
  0x69   : > { %p2364_p8 = scmp.lt.u32.totalorder %s2355_s13, %s2789_s20 }
  0x6a   : > { %p2358_p2 = pnand %p2356_p11, %p2708_p4  ;;  %p2363_p10 = por %p2362_p7, %p2361_p5 }
  0x6c   : > { %p2359_p3 = pneg %p2358_p2  ;;  %p2365_p9 = por %p2364_p8, %p2363_p10 }
  0x6e   : > { %p2366_p12 = pnand %p2365_p9, %p2359_p3 }
  0x70   : > { %2369 = shalt.err (!%p2366_p12)
}
  0x71   : > { %s2370_s29 = scalar_lea.vmem %s2792_s9, 128  ;;  %s2541_s18 = smov [#allocation2]  }
  0x72   : > { %p2371_p1 = scmp.ne.s32.totalorder %s2792_s9, %s2370_s29  ;;  %s2375_s17 = sshll.u32 %s2541_s18, 4  ;;  %s2376_s17 = int_to_ptr.vmem [resolvable:$false] %s2375_s17 }
  0x73   : > { %s2377_s2 = scalar_lea.vmem %s2376_s17, 256  ;;  %p2378_p11 = scmp.lt.s32.totalorder %s2792_s9, %s2376_s17 }
  0x74   : > { %p2373_p6 = pnand %p2371_p1, %p2708_p4  ;;  %p2379_p2 = scmp.lt.s32.totalorder %s2377_s2, %s2370_s29 }
  0x76   : > { %p2374_p13 = pneg %p2373_p6  ;;  %p2380_p5 = por %p2379_p2, %p2378_p11 }
  0x78   : > { %p2381_p7 = pnand %p2380_p5, %p2374_p13 }
  0x7a   : > { %2384 = shalt.err (!%p2381_p7)
}
  0x7b   : > { %s3265_s13 = smov 4   ;;  %s3266_s23 = smov 64  }
  0x7c   : > { %2163 = dma.hbm_to_vmem [thread:$0]  (!%p2684_p0), %s2789_s20, 128, %s2792_s9, %s332_s22, %s3266_s23, %s3266_s23, %s3265_s13  }
  0x7d   : > { %s2825_s3 = scalar_lea.hbm %s3214_s4, %s2680_s27  ;;  %s392_s29 = scalar_lea.vmem [#allocation7], %s2677_s26 }
  0x7e   : > { %s399_s18 = sshll.u32 %s392_s29, 4  ;;  %s3267_s17 = sshll.u32 %s2674_s25, 2  ;;  %s2828_s18 = int_to_ptr.vmem [resolvable:$true] %s399_s18 }
  0x7f   : > { %s2832_s2 = scalar_lea.vmem [#allocation10], %s3267_s17  ;;  %s2385_s5 = scalar_lea.hbm %s2825_s3, 128 }
  0x80   : > { %s438_s1 = sshll.u32 %s2832_s2, 4  ;;  %p2386_p3 = scmp.ne.s32.totalorder %s2825_s3, %s2385_s5  ;;  %s439_s1 = int_to_ptr.vmem [resolvable:$true] %s438_s1 }
  0x81   : > { %s2390_s9 = scalar_lea.hbm %s3214_s4, 256  ;;  %p2391_p9 = scmp.lt.u32.totalorder %s2825_s3, %s3214_s4 }
  0x82   : > { %p2388_p10 = pnand %p2386_p3, %p2708_p4  ;;  %p2392_p12 = scmp.lt.u32.totalorder %s2390_s9, %s2385_s5 }
  0x83   : > { %p2394_p6 = scmp.lt.u32.totalorder %s2385_s5, %s2825_s3 }
  0x84   : > { %p2389_p8 = pneg %p2388_p10  ;;  %p2393_p1 = por %p2392_p12, %p2391_p9 }
  0x86   : > { %p2395_p13 = por %p2394_p6, %p2393_p1 }
  0x88   : > { %p2396_p11 = pnand %p2395_p13, %p2389_p8 }
  0x8a   : > { %2399 = shalt.err (!%p2396_p11)
}
  0x8b   : > { %s2400_s25 = scalar_lea.vmem %s2828_s18, 128  ;;  %s2542_s26 = smov [#allocation7]  }
  0x8c   : > { %p2401_p2 = scmp.ne.s32.totalorder %s2828_s18, %s2400_s25  ;;  %s2405_s30 = sshll.u32 %s2542_s26, 4  ;;  %s2406_s30 = int_to_ptr.vmem [resolvable:$false] %s2405_s30 }
  0x8d   : > { %s2407_s29 = scalar_lea.vmem %s2406_s30, 256  ;;  %p2408_p3 = scmp.lt.s32.totalorder %s2828_s18, %s2406_s30 }
  0x8e   : > { %p2403_p5 = pnand %p2401_p2, %p2708_p4  ;;  %p2409_p10 = scmp.lt.s32.totalorder %s2407_s29, %s2400_s25 }
  0x90   : > { %p2404_p7 = pneg %p2403_p5  ;;  %p2410_p9 = por %p2409_p10, %p2408_p3 }
  0x92   : > { %p2411_p12 = pnand %p2410_p9, %p2404_p7 }
  0x94   : > { %2414 = shalt.err (!%p2411_p12)
}
  0x95   : > { %2169 = dma.hbm_to_vmem [thread:$0]  (!%p2684_p0), %s2825_s3, 128, %s2828_s18, %s2702_s19, %s3266_s23, %s3266_s23, %s3265_s13  }
  0x96   : > { %s2415_s5 = scalar_lea.hbm %s2757_s11, 64  ;;  %s2420_s20 = scalar_lea.hbm %s3216_s6, 128 }
  0x97   : > { %p2416_p8 = scmp.ne.s32.totalorder %s2757_s11, %s2415_s5  ;;  %p2421_p13 = scmp.lt.u32.totalorder %s2757_s11, %s3216_s6 }
  0x98   : > { %p2422_p11 = scmp.lt.u32.totalorder %s2420_s20, %s2415_s5  ;;  %p2424_p5 = scmp.lt.u32.totalorder %s2415_s5, %s2757_s11 }
  0x99   : > { %p2418_p1 = pnand %p2416_p8, %p2708_p4 }
  0x9a   : > { %p2423_p2 = por %p2422_p11, %p2421_p13 }
  0x9b   : > { %p2419_p6 = pneg %p2418_p1 }
  0x9c   : > { %p2425_p7 = por %p2424_p5, %p2423_p2 }
  0x9e   : > { %p2426_p3 = pnand %p2425_p7, %p2419_p6 }
  0xa0   : > { %2429 = shalt.err (!%p2426_p3)
}
  0xa1   : > { %s2430_s19 = scalar_lea.vmem %s439_s1, 64  ;;  %s2543_s13 = smov [#allocation10]  }
  0xa2   : > { %p2431_p10 = scmp.ne.s32.totalorder %s439_s1, %s2430_s19  ;;  %s2435_s23 = sshll.u32 %s2543_s13, 4  ;;  %s2436_s23 = int_to_ptr.vmem [resolvable:$false] %s2435_s23 }
  0xa3   : > { %s2437_s3 = scalar_lea.vmem %s2436_s23, 128  ;;  %p2438_p8 = scmp.lt.s32.totalorder %s439_s1, %s2436_s23 }
  0xa4   : > { %p2433_p9 = pnand %p2431_p10, %p2708_p4  ;;  %p2439_p1 = scmp.lt.s32.totalorder %s2437_s3, %s2430_s19 }
  0xa6   : > { %p2434_p12 = pneg %p2433_p9  ;;  %p2440_p0 = por %p2439_p1, %p2438_p8 }
  0xa8   : > { %p2441_p11 = pnand %p2440_p0, %p2434_p12 }
  0xaa   : > { %2444 = shalt.err (!%p2441_p11)
}
  0xab   : > { %p3268_p13 = scmp.ne.s32.totalorder %s3256_s28, 0  ;;  %p3269_p6 = scmp.ne.s32.totalorder %s3261_s24, 0 }
  0xac   : > { %s2883_s16 = sand.u32 (!%p3269_p6), 1, %s2519_s10   ;;  %p3270_p0 = scmp.ne.s32.totalorder (!%p3269_p6), %s3250_s21, 0 }
  0xad   : > { %2175 = dma.hbm_to_vmem [thread:$0]  (!%p3268_p13), %s2757_s11, 64, %s439_s1, %s2761_s8  }
  0xae   : > { %447 = sbr.rel (%p3269_p6) target bundleno = 3439 (0xd6f), region = 56  ;;  %s2886_s18 = sshll.u32 (!%p3269_p6), %s2883_s16, 3 }
  0xaf   : > { %s450_s2 = scalar_lea.sflag (!%p3269_p6), [#allocation3], %s2883_s16  ;;  %s453_s7 = scalar_lea.vmem (!%p3269_p6), [#allocation2], %s2886_s18 }
  0xb5   : > { %2498 = dma.done.wait (%p3270_p0), %s450_s2, 128  }
  0xb6   : > { %2500 = vsyncadd (%p3270_p0), %s450_s2, 4294967168  ;;  %s458_s1 = sand.u32 1, %s2636_s15   ;;  %s462_s28 = scalar_lea.vmem [#allocation5], %s2886_s18 }
  0xb7   : > { %s459_s8 = scalar_lea.sflag [#allocation6], %s458_s1 }
  0xb8   : > { %2502 = dma.done.wait (%p3270_p0), %s459_s8, 256  }
  0xb9   : > { %2504 = vsyncadd (%p3270_p0), %s459_s8, 4294967040  ;;  %s1950_s11 = sshll.u32 %s2883_s16, 2  ;;  %s471_s24 = scalar_lea.vmem [#allocation7], %s2886_s18 }
  0xba   : > { %s477_s25 = scalar_lea.sflag [#allocation9], %s458_s1  ;;  %s2904_s26 = scalar_lea.vmem [#allocation8], %s1950_s11 }
  0xbb   : > { %2506 = dma.done.wait (%p3270_p0), %s477_s25, 128  }
  0xbc   : > { %2508 = vsyncadd (%p3270_p0), %s477_s25, 4294967168  ;;  %p558_p4 = scmp.lt.s32.totalorder %s2527_s12, 1  ;;  %v2544_v0 = vmov 0.0   ;;  %vm2545_vm0 = vmmov 0   ;;  %vm612_vm1 = vcmask 64512   ;;  %v2923_v2 = vld [vmem:[%s462_s28] sm:$0xff]   ;;  %v598_v15 = vlaneseq }
  0xbd   : > { %2044 = vmatprep.subr.bf16.mxu0 %v2544_v0  ;;  %2050 = vmatprep.subr.bf16.mxu1 %v2544_v0  ;;  %s3271_s20 = sld [smem:[#allocation25_spill]]  ;;  %v590_v4 = vld [vmem:[%s453_s7] sm:$0xf]  ;;  %v591_v5 = vld [vmem:[%s453_s7 + $0x4] sm:$0xf]  ;;  %v678_v6 = vsel %vm612_vm1, %v2923_v2, 0 }
  0xbe   : > { %s559_s15 = scalar_select %p558_p4, %s2527_s12, 1  ;;  %2046 = vmatprep.mubr.msk.bf16.mxu0 %vm2545_vm0, %v2544_v0  ;;  %2052 = vmatprep.mubr.msk.bf16.mxu1 %vm2545_vm0, %v2544_v0  ;;  %v592_v7 = vmul.bf16 1052065461, %v590_v4  ;;  %v593_v8 = vmul.bf16 1052065461, %v591_v5  ;;  %v2946_v16 = vshrl.u32 %v598_v15, 7 }
  0xbf   : > { %2051 = vmatpush3.bf16.xpose.msra.mxu1 %v678_v6  ;;  %v2950_v18 = vld [vmem:[%s2904_s26] sm:$0xf]  ;;  %s489_s22 = scalar_lea.vmem [#allocation10], %s1950_s11  ;;  %vm721_vm2 = vcmask 130048   ;;  %s3272_s23 = sld [smem:[#allocation27_spill]]  ;;  %vm784_vm3 = vcmask 261120  }
  0xc0   : > { %s1997_s30 = sshll.u32 %s559_s15, 3  ;;  %2064 = vmatprep.subr.bf16.mxu1 %v2544_v0  ;;  %v2934_v13 = vcombine.low %v592_v7, %v593_v8  ;;  %v600_v17 = vsub.s32 0, %v2946_v16  ;;  %v2954_v19 = vld [vmem:[%s489_s22] sm:$0xf]  ;;  %s2546_s7 = smov 16   ;;  %v2997_v15 = vld [vmem:[%s471_s24] sm:$0xff]  }
  0xc1   : > { %s562_s5 = scalar_lea.vmem %s3210_s0, %s1997_s30  ;;  %s2547_s1 = smov 120   ;;  %vm897_vm4 = vcmask 60416   ;;  %vm1167_vm5 = vcmask 126016   ;;  %vm1437_vm6 = vcmask 191616   ;;  %vm1707_vm7 = vcmask 257216  }
  0xc2   : > { %v2921_v1 = vld [vmem:[%s562_s5] sm:$0xff]   ;;  %v601_v20 = vrot.slane %v2950_v18, %v600_v17  ;;  %v663_v21 = vrot.slane %v2954_v19, %v600_v17  ;;  %s3273_s11 = sld [smem:[#allocation28_spill]]  ;;  %s3028_s24 = scalar_lea.vmem [#allocation11], %s2886_s18 }
  0xc3   : > { %s572_s9 = scalar_lea.vmem %s3271_s20, %s1997_s30  ;;  %v617_v3 = vsel %vm612_vm1, %v2921_v1, 0  ;;  %s2548_s18 = smov 112  }
  0xc4   : > { %2045 = vmatpush3.bf16.xpose.msra.mxu0 %v617_v3  ;;  %v594_v9 = vld [vmem:[%s572_s9] sm:$0xf]  ;;  %v595_v10 = vld [vmem:[%s572_s9 + $0x4] sm:$0xf]  ;;  %s2549_s25 = smov 104   ;;  %s2550_s26 = smov 8  }
  0xc5   : > { %2056 = vmatprep.subr.bf16.mxu0 %v2544_v0  ;;  %v596_v11 = vmul.bf16 1052065461, %v594_v9  ;;  %v597_v12 = vmul.bf16 1052065461, %v595_v10  ;;  %v2965_v38 = vld [vmem:[%s3272_s23] sm:$0xff]   ;;  %v2971_v39 = vld [vmem:[%s3272_s23 + $0x8] sm:$0xff]  }
  0xc6   : > { %s2551_s15 = smov 24   ;;  %s3274_s30 = sld [smem:[#allocation20_spill]] }
  0xc7   : > { %v2936_v14 = vcombine.low %v596_v11, %v597_v12  ;;  %s2007_s29 = sshll.u32 %s2527_s12, 7  ;;  %s1726_s21 = sshll.u32 %s3028_s24, 4  ;;  %s3160_s21 = int_to_ptr.vmem [resolvable:$true] %s1726_s21 }
  0xc8   : > { %s3275_s27 = sld [smem:[#allocation29_spill]]  ;;  %s1711_s9 = scalar_lea.sflag [#allocation4], %s2883_s16 }
  0xc9   : > { %2053 = vmatmul.mubr.msk.bf16.vlgmr.msra.gmra.mrb[0].mxu1 %vm612_vm1, %v2936_v14  ;;  %s2445_s22 = scalar_lea.vmem %s3160_s21, 128  ;;  %s2552_s12 = smov [#allocation11]  }
  0xca   : > { %2066 = vmatprep.mubr.msk.bf16.mxu1 %vm2545_vm0, %v2544_v0  ;;  %2065 = vmatpush3.bf16.msra.mxu1 %v2997_v15  ;;  %p2446_p2 = scmp.ne.s32.totalorder %s3160_s21, %s2445_s22  ;;  %s2449_s19 = sshll.u32 %s2552_s12, 4  ;;  %s2450_s19 = int_to_ptr.vmem [resolvable:$false] %s2449_s19 }
  0xcb   : > { %2047 = vmatmul.mubr.msk.bf16.vlgmr.msra.gmra.mrb[0].mxu0 %vm612_vm1, %v2934_v13  ;;  %2076 = vmatprep.subr.bf16.mxu1 %v2544_v0  ;;  %s2451_s13 = scalar_lea.vmem %s2450_s19, 256  ;;  %p2452_p10 = scmp.lt.s32.totalorder %s3160_s21, %s2450_s19 }
  0xcc   : > { %2060 = vmatprep.mubr.msk.bf16.mxu0 %vm2545_vm0, %v2544_v0  ;;  %2057 = vmatpush3.bf16.msra.mxu0 %v2965_v38  ;;  %p3276_p5 = scmp.ne.s32.totalorder %s3274_s30, 0  ;;  %p2453_p9 = scmp.lt.s32.totalorder %s2451_s13, %s2445_s22 }
  0xcd   : > { %2058 = vmatprep.subr.bf16.mxu0 %v2544_v0 }
  0xce   : > { %s3158_s20 = scalar_lea.hbm %s3275_s27, %s2007_s29  ;;  %p2447_p7 = pnand %p2446_p2, %p3276_p5 }
  0xcf   : > { %p2454_p12 = por %p2453_p9, %p2452_p10 }
  0xd0   : > { %2059 = vmatpush3.bf16.msra.mxu0 %v2971_v39  ;;  %p2448_p3 = pneg %p2447_p7 }
  0xd1   : > { %2070 = vmatprep.subr.bf16.mxu0 %v2544_v0 }
  0xd2   : > { %p2455_p8 = pnand %p2454_p12, %p2448_p3 }
 0x19c   : > { %v714_v24 = vpop.f32.mrb[0].mxu1 }
 0x19d   : > { %v715_v26 = vadd.f32 %v714_v24, %v663_v21  ;;  %v2054_v27 = vpop.f32.mrb[1].mxu1 }
 0x19e   : > { %v653_v22 = vpop.f32.mrb[0].mxu0  ;;  %v717_v30 = vpop.f32.mrb[2].mxu1 }
 0x19f   : > { %v654_v23 = vadd.f32 %v653_v22, %v601_v20  ;;  %v2048_v25 = vpop.f32.mrb[1].mxu0  ;;  %v718_v33 = vadd.f32 %v717_v30, %v663_v21  ;;  %v2055_v34 = vpop.f32.mrb[3].mxu1  ;;  %v728_v35 = vsel %vm721_vm2, %v715_v26, -inf }
 0x1a0   : > { %v656_v28 = vpop.f32.mrb[2].mxu0  ;;  %729 = vmax.xlane.f32.xlu1 %v728_v35  ;;  %v902_v35 = vsub.s32 1, %v2946_v16 }
 0x1a1   : > { %v657_v29 = vadd.f32 %v656_v28, %v601_v20  ;;  %v2049_v31 = vpop.f32.mrb[3].mxu0  ;;  %v722_v32 = vsel %vm721_vm2, %v654_v23, -inf  ;;  %v731_v37 = vsel %vm721_vm2, %v718_v33, -inf }
 0x1a2   : > { %723 = vmax.xlane.f32.xlu0 %v722_v32 }
 0x1a3   : > { %v725_v36 = vsel %vm721_vm2, %v657_v29, -inf }
 0x1a4   : > { %732 = vmax.xlane.f32.xlu1 %v731_v37 }
 0x1a6   : > { %726 = vmax.xlane.f32.xlu0 %v725_v36  ;;  %v903_v36 = vrot.slane %v2950_v18, %v902_v35 }
 0x22d   : > { %v730_v41 = vpop.xlane.xlu1 %729 }
 0x22f   : > { %v724_v40 = vpop.xlane.xlu0 %723 }
 0x230   : > { %v734_v42 = vmax.f32 %v724_v40, %v730_v41 }
 0x231   : > { %v733_v46 = vpop.xlane.xlu1 %732 }
 0x232   : > { %v736_v43 = vsub.f32 %v654_v23, %v734_v42  ;;  %v742_v44 = vsub.f32 %v715_v26, %v734_v42  ;;  %v3011_v26 = vld [vmem:[%s3273_s11] ss:$0 sm:$0xff] }
 0x233   : > { %v727_v45 = vpop.xlane.xlu0 %726 }
 0x234   : > { %v738_v47 = vmul.f32 1.442695, %v736_v43  ;;  %v735_v48 = vmax.f32 %v727_v45, %v733_v46  ;;  %v744_v49 = vmul.f32 1.442695, %v742_v44 }
 0x236   : > { %2247 = vpow2.f32 %v738_v47  ;;  %v737_v50 = vsub.f32 %v657_v29, %v735_v48  ;;  %v743_v51 = vsub.f32 %v718_v33, %v735_v48 }
 0x237   : > { %2249 = vpow2.f32 %v744_v49 }
 0x238   : > { %v740_v52 = vmul.f32 1.442695, %v737_v50  ;;  %v746_v53 = vmul.f32 1.442695, %v743_v51 }
 0x23a   : > { %2251 = vpow2.f32 %v740_v52 }
 0x23b   : > { %2253 = vpow2.f32 %v746_v53  ;;  %v958_v53 = vrot.slane %v2954_v19, %v902_v35 }
 0x240   : > { %v2248_v54 = vpop.eup %2247 }
 0x241   : > { %v748_v55 = vsel %vm721_vm2, %v2248_v54, 0.0  ;;  %v2250_v56 = vpop.eup %2249 }
 0x242   : > { %749 = vadd.xlane.f32.xlu1 %v748_v55  ;;  %v754_v62 = vsel %vm721_vm2, %v2250_v56, 0.0 }
 0x244   : > { %v2252_v57 = vpop.eup %2251 }
 0x245   : > { %v2254_v58 = vpop.eup %2253  ;;  %v751_v59 = vsel %vm721_vm2, %v2252_v57, 0.0  ;;  %v764_v60 = vpack.c.bf16 %v2252_v57, %v2248_v54 }
 0x246   : > { %752 = vadd.xlane.f32.xlu1 %v751_v59  ;;  %v765_v61 = vpack.c.bf16 %v2254_v58, %v2250_v56  ;;  %v757_v63 = vsel %vm721_vm2, %v2254_v58, 0.0 }
 0x248   : > { %767 = vrot.lane.b32.xlu0 %v765_v61, %s2546_s7 }
 0x24a   : > { %755 = vadd.xlane.f32.xlu1 %v754_v62 }
 0x24c   : > { %961 = vrot.lane.b32.xlu0 %v2923_v2, %s2547_s1 }
 0x24e   : > { %758 = vadd.xlane.f32.xlu1 %v757_v63 }
 0x250   : > { %904 = vrot.lane.b32.xlu0 %v2934_v13, %s2547_s1 }
 0x254   : > { %959 = vrot.lane.b32.xlu0 %v2936_v14, %s2547_s1 }
 0x25f   : > { %906 = vrot.lane.b32.xlu1 %v2921_v1, %s2547_s1 }
 0x2ba   : > { %v768_v3 = vpop.permute.xlu0 %767 }
 0x2bb   : > { %v771_v4 = vsel %vm721_vm2, %v764_v60, %v768_v3 }
 0x2bc   : > { %2061 = vmatmul.mubr.msk.bf16.vlgmr.msra.gmra.mrb[4].mxu0 %vm784_vm3, %v771_v4 }
 0x2bd   : > { %2072 = vmatprep.mubr.msk.bf16.mxu0 %vm2545_vm0, %v2544_v0 }
 0x2be   : > { %v962_v17 = vpop.permute.xlu0 %961 }
 0x2bf   : > { %v967_v33 = vsel %vm612_vm1, %v962_v17, 0 }
 0x2c2   : > { %v905_v20 = vpop.permute.xlu0 %904 }
 0x2c6   : > { %v960_v34 = vpop.permute.xlu0 %959 }
 0x2cf   : > { %v750_v5 = vpop.xlane.xlu1 %749 }
 0x2d3   : > { %v753_v6 = vpop.xlane.xlu1 %752 }
 0x2d7   : > { %v756_v7 = vpop.xlane.xlu1 %755 }
 0x2d8   : > { %v760_v8 = vadd.f32 %v756_v7, %v750_v5 }
 0x2da   : > { %2255 = vrcp.f32 %v760_v8 }
 0x2db   : > { %v759_v9 = vpop.xlane.xlu1 %758 }
 0x2dc   : > { %v761_v10 = vadd.f32 %v759_v9, %v753_v6 }
 0x2de   : > { %2257 = vrcp.f32 %v761_v10 }
 0x2df   : > { %v907_v11 = vpop.permute.xlu1 %906 }
 0x2e0   : > { %v912_v12 = vsel %vm612_vm1, %v907_v11, 0 }
 0x2e1   : > { %2071 = vmatpush3.bf16.xpose.msra.mxu0 %v912_v12 }
 0x2e2   : > { %2082 = vmatprep.subr.bf16.mxu0 %v2544_v0 }
 0x2e4   : > { %v2256_v21 = vpop.eup %2255 }
 0x2e8   : > { %2073 = vmatmul.mubr.msk.bf16.vlgmr.msra.gmra.mrb[8].mxu0 %vm612_vm1, %v905_v20  ;;  %v2258_v25 = vpop.eup %2257 }
 0x2e9   : > { %2083 = vmatpush3.bf16.msra.mxu0 %v2965_v38  ;;  %2086 = vmatprep.mubr.msk.bf16.mxu0 %vm2545_vm0, %v2544_v0 }
 0x2ea   : > { %2084 = vmatprep.subr.bf16.mxu0 %v2544_v0 }
 0x2ed   : > { %2085 = vmatpush3.bf16.msra.mxu0 %v2971_v39 }
 0x2ee   : > { %2096 = vmatprep.subr.bf16.mxu0 %v2544_v0 }
 0x38f   : > { %v821_v22 = vpop.f32.mrb[4].mxu0 }
 0x390   : > { %v828_v23 = vmul.f32 %v2256_v21, %v821_v22  ;;  %v2062_v24 = vpop.f32.mrb[5].mxu0 }
 0x391   : > { %v824_v27 = vpop.f32.mrb[6].mxu0 }
 0x392   : > { %v829_v28 = vmul.f32 %v2258_v25, %v824_v27  ;;  %v2063_v29 = vpop.f32.mrb[7].mxu0  ;;  %v836_v30 = vadd.f32 %v3011_v26, %v828_v23 }
 0x394   : > { %v837_v31 = vadd.f32 %v3011_v26, %v829_v28 }
 0x396   : > { %v838_v32 = vpack.c.bf16 %v837_v31, %v836_v30 }
 0x398   : > { %2067 = vmatmul.mubr.msk.bf16.vlgmr.msra.gmra.mrb[4].mxu1 %vm721_vm2, %v838_v32 }
 0x399   : > { %2077 = vmatpush3.bf16.xpose.msra.mxu1 %v967_v33  ;;  %2078 = vmatprep.mubr.msk.bf16.mxu1 %vm2545_vm0, %v2544_v0 }
 0x39a   : > { %2090 = vmatprep.subr.bf16.mxu1 %v2544_v0 }
 0x3a0   : > { %2079 = vmatmul.mubr.msk.bf16.vlgmr.msra.gmra.mrb[8].mxu1 %vm612_vm1, %v960_v34 }
 0x3a1   : > { %2092 = vmatprep.mubr.msk.bf16.mxu1 %vm2545_vm0, %v2544_v0 }
 0x3bb   : > { %v948_v37 = vpop.f32.mrb[8].mxu0 }
 0x3bc   : > { %v2074_v40 = vpop.f32.mrb[9].mxu0  ;;  %v949_v41 = vadd.f32 %v948_v37, %v903_v36 }
 0x3bd   : > { %v951_v42 = vpop.f32.mrb[10].mxu0 }
 0x3be   : > { %v952_v43 = vadd.f32 %v951_v42, %v903_v36  ;;  %v2075_v44 = vpop.f32.mrb[11].mxu0  ;;  %v1010_v45 = vsel %vm721_vm2, %v949_v41, -inf }
 0x3bf   : > { %1011 = vmax.xlane.f32.xlu1 %v1010_v45 }
 0x3c0   : > { %v1013_v46 = vsel %vm721_vm2, %v952_v43, -inf }
 0x3c1   : > { %1014 = vmax.xlane.f32.xlu0 %v1013_v46 }
 0x44c   : > { %v1012_v63 = vpop.xlane.xlu1 %1011 }
 0x44e   : > { %v1015_v62 = vpop.xlane.xlu0 %1014 }
 0x46b   : > { %v882_v47 = vpop.f32.mrb[4].mxu1 }
 0x46c   : > { %v1999_v48 = vpack.c.bf16 %v882_v47, %v882_v47  ;;  %v2068_v49 = vpop.f32.mrb[5].mxu1 }
 0x46d   : > { %v885_v50 = vpop.f32.mrb[6].mxu1 }
 0x46e   : > { %898 = vst.msk [vmem:[%s3028_s24] sm:$0xf] %vm897_vm4, %v1999_v48  ;;  %v2000_v51 = vpack.c.bf16 %v885_v50, %v885_v50  ;;  %v2069_v52 = vpop.f32.mrb[7].mxu1 }
 0x470   : > { %899 = vst.msk [vmem:[%s3028_s24 + $0x4] sm:$0xf] %vm897_vm4, %v2000_v51 }
 0x473   : > { %v1003_v54 = vpop.f32.mrb[8].mxu1 }
 0x474   : > { %v1004_v55 = vadd.f32 %v1003_v54, %v958_v53  ;;  %v2080_v56 = vpop.f32.mrb[9].mxu1 }
 0x475   : > { %v1006_v57 = vpop.f32.mrb[10].mxu1 }
 0x476   : > { %v1007_v58 = vadd.f32 %v1006_v57, %v958_v53  ;;  %v2081_v59 = vpop.f32.mrb[11].mxu1  ;;  %v1016_v60 = vsel %vm721_vm2, %v1004_v55, -inf }
 0x477   : > { %1017 = vmax.xlane.f32.xlu0 %v1016_v60  ;;  %v1172_v60 = vsub.s32 2, %v2946_v16 }
 0x478   : > { %v1019_v61 = vsel %vm721_vm2, %v1007_v58, -inf }
 0x47b   : > { %1020 = vmax.xlane.f32.xlu0 %v1019_v61 }
 0x504   : > { %v1018_v3 = vpop.xlane.xlu0 %1017 }
 0x505   : > { %v1022_v4 = vmax.f32 %v1012_v63, %v1018_v3  ;;  %v1173_v63 = vrot.slane %v2950_v18, %v1172_v60 }
 0x507   : > { %v1024_v5 = vsub.f32 %v949_v41, %v1022_v4  ;;  %v1030_v6 = vsub.f32 %v1004_v55, %v1022_v4 }
 0x508   : > { %v1021_v7 = vpop.xlane.xlu0 %1020 }
 0x509   : > { %v1026_v8 = vmul.f32 1.442695, %v1024_v5  ;;  %v1023_v9 = vmax.f32 %v1015_v62, %v1021_v7  ;;  %v1032_v10 = vmul.f32 1.442695, %v1030_v6 }
 0x50b   : > { %2259 = vpow2.f32 %v1026_v8  ;;  %v1025_v11 = vsub.f32 %v952_v43, %v1023_v9  ;;  %v1031_v12 = vsub.f32 %v1007_v58, %v1023_v9 }
 0x50c   : > { %2261 = vpow2.f32 %v1032_v10 }
 0x50d   : > { %v1028_v17 = vmul.f32 1.442695, %v1025_v11  ;;  %v1034_v20 = vmul.f32 1.442695, %v1031_v12 }
 0x50f   : > { %2263 = vpow2.f32 %v1028_v17  ;;  %v1228_v17 = vrot.slane %v2954_v19, %v1172_v60 }
 0x510   : > { %2265 = vpow2.f32 %v1034_v20 }
 0x515   : > { %v2260_v21 = vpop.eup %2259 }
 0x516   : > { %v1036_v22 = vsel %vm721_vm2, %v2260_v21, 0.0  ;;  %v2262_v23 = vpop.eup %2261 }
 0x517   : > { %1037 = vadd.xlane.f32.xlu0 %v1036_v22  ;;  %v1042_v30 = vsel %vm721_vm2, %v2262_v23, 0.0 }
 0x519   : > { %v2264_v24 = vpop.eup %2263 }
 0x51a   : > { %v2266_v25 = vpop.eup %2265  ;;  %v1039_v27 = vsel %vm721_vm2, %v2264_v24, 0.0  ;;  %v1052_v28 = vpack.c.bf16 %v2264_v24, %v2260_v21 }
 0x51b   : > { %1040 = vadd.xlane.f32.xlu0 %v1039_v27  ;;  %v1053_v29 = vpack.c.bf16 %v2266_v25, %v2262_v23  ;;  %v1045_v31 = vsel %vm721_vm2, %v2266_v25, 0.0 }
 0x51d   : > { %1055 = vrot.lane.b32.xlu1 %v1053_v29, %s2546_s7 }
 0x51f   : > { %1043 = vadd.xlane.f32.xlu0 %v1042_v30 }
 0x521   : > { %1108 = vrot.lane.b32.xlu1 %v2997_v15, %s2547_s1 }
 0x523   : > { %1046 = vadd.xlane.f32.xlu0 %v1045_v31 }
 0x525   : > { %1231 = vrot.lane.b32.xlu1 %v2923_v2, %s2548_s18 }
 0x529   : > { %1174 = vrot.lane.b32.xlu1 %v2934_v13, %s2548_s18 }
 0x52d   : > { %1229 = vrot.lane.b32.xlu1 %v2936_v14, %s2548_s18 }
 0x539   : > { %1176 = vrot.lane.b32.xlu0 %v2921_v1, %s2548_s18 }
 0x58f   : > { %v1056_v32 = vpop.permute.xlu1 %1055 }
 0x590   : > { %v1059_v33 = vsel %vm721_vm2, %v1052_v28, %v1056_v32 }
 0x591   : > { %2087 = vmatmul.mubr.msk.bf16.vlgmr.msra.gmra.mrb[12].mxu0 %vm784_vm3, %v1059_v33 }
 0x592   : > { %2098 = vmatprep.mubr.msk.bf16.mxu0 %vm2545_vm0, %v2544_v0 }
 0x593   : > { %v1109_v34 = vpop.permute.xlu1 %1108 }
 0x594   : > { %2091 = vmatpush3.bf16.msra.mxu1 %v1109_v34 }
 0x595   : > { %2102 = vmatprep.subr.bf16.mxu1 %v2544_v0 }
 0x597   : > { %v1232_v45 = vpop.permute.xlu1 %1231 }
 0x598   : > { %v1237_v58 = vsel %vm612_vm1, %v1232_v45, 0 }
 0x59b   : > { %v1175_v46 = vpop.permute.xlu1 %1174 }
 0x59f   : > { %v1230_v59 = vpop.permute.xlu1 %1229 }
 0x5a4   : > { %v1038_v35 = vpop.xlane.xlu0 %1037 }
 0x5a8   : > { %v1041_v36 = vpop.xlane.xlu0 %1040 }
 0x5ac   : > { %v1044_v37 = vpop.xlane.xlu0 %1043 }
 0x5ad   : > { %v1048_v40 = vadd.f32 %v1044_v37, %v1038_v35 }
 0x5af   : > { %2267 = vrcp.f32 %v1048_v40 }
 0x5b0   : > { %v1047_v41 = vpop.xlane.xlu0 %1046 }
 0x5b1   : > { %v1049_v42 = vadd.f32 %v1047_v41, %v1041_v36 }
 0x5b3   : > { %2269 = vrcp.f32 %v1049_v42 }
 0x5b4   : > { %v1177_v43 = vpop.permute.xlu0 %1176 }
 0x5b5   : > { %v1182_v44 = vsel %vm612_vm1, %v1177_v43, 0 }
 0x5b6   : > { %2097 = vmatpush3.bf16.xpose.msra.mxu0 %v1182_v44 }
 0x5b7   : > { %2108 = vmatprep.subr.bf16.mxu0 %v2544_v0 }
 0x5b9   : > { %v2268_v47 = vpop.eup %2267 }
 0x5bd   : > { %2099 = vmatmul.mubr.msk.bf16.vlgmr.msra.gmra.mrb[16].mxu0 %vm612_vm1, %v1175_v46  ;;  %v2270_v51 = vpop.eup %2269 }
 0x5be   : > { %2109 = vmatpush3.bf16.msra.mxu0 %v2965_v38  ;;  %2112 = vmatprep.mubr.msk.bf16.mxu0 %vm2545_vm0, %v2544_v0 }
 0x5bf   : > { %2110 = vmatprep.subr.bf16.mxu0 %v2544_v0 }
 0x5c2   : > { %2111 = vmatpush3.bf16.msra.mxu0 %v2971_v39 }
 0x5c3   : > { %2122 = vmatprep.subr.bf16.mxu0 %v2544_v0 }
 0x664   : > { %v1096_v48 = vpop.f32.mrb[12].mxu0 }
 0x665   : > { %v1103_v49 = vmul.f32 %v2268_v47, %v1096_v48  ;;  %v2088_v50 = vpop.f32.mrb[13].mxu0 }
 0x666   : > { %v1099_v52 = vpop.f32.mrb[14].mxu0 }
 0x667   : > { %v1104_v53 = vmul.f32 %v2270_v51, %v1099_v52  ;;  %v2089_v54 = vpop.f32.mrb[15].mxu0  ;;  %v1105_v55 = vadd.f32 %v3011_v26, %v1103_v49 }
 0x669   : > { %v1106_v56 = vadd.f32 %v3011_v26, %v1104_v53 }
 0x66b   : > { %v1107_v57 = vpack.c.bf16 %v1106_v56, %v1105_v55 }
 0x66d   : > { %2093 = vmatmul.mubr.msk.bf16.vlgmr.msra.gmra.mrb[12].mxu1 %vm721_vm2, %v1107_v57 }
 0x66e   : > { %2103 = vmatpush3.bf16.xpose.msra.mxu1 %v1237_v58  ;;  %2104 = vmatprep.mubr.msk.bf16.mxu1 %vm2545_vm0, %v2544_v0 }
 0x66f   : > { %2116 = vmatprep.subr.bf16.mxu1 %v2544_v0 }
 0x675   : > { %2105 = vmatmul.mubr.msk.bf16.vlgmr.msra.gmra.mrb[16].mxu1 %vm612_vm1, %v1230_v59 }
 0x676   : > { %2118 = vmatprep.mubr.msk.bf16.mxu1 %vm2545_vm0, %v2544_v0 }
 0x690   : > { %v1218_v61 = vpop.f32.mrb[16].mxu0 }
 0x691   : > { %v2100_v62 = vpop.f32.mrb[17].mxu0  ;;  %v1219_v5 = vadd.f32 %v1218_v61, %v1173_v63 }
 0x692   : > { %v1221_v3 = vpop.f32.mrb[18].mxu0 }
 0x693   : > { %v2101_v4 = vpop.f32.mrb[19].mxu0  ;;  %v1222_v6 = vadd.f32 %v1221_v3, %v1173_v63  ;;  %v1280_v7 = vsel %vm721_vm2, %v1219_v5, -inf }
 0x694   : > { %1281 = vmax.xlane.f32.xlu1 %v1280_v7 }
 0x695   : > { %v1283_v8 = vsel %vm721_vm2, %v1222_v6, -inf }
 0x696   : > { %1284 = vmax.xlane.f32.xlu0 %v1283_v8 }
 0x721   : > { %v1282_v29 = vpop.xlane.xlu1 %1281 }
 0x723   : > { %v1285_v30 = vpop.xlane.xlu0 %1284 }
 0x740   : > { %v3078_v9 = vpop.f32.mrb[12].mxu1 }
 0x741   : > { %v2094_v10 = vpop.f32.mrb[13].mxu1 }
 0x742   : > { %v3080_v11 = vpop.f32.mrb[14].mxu1 }
 0x743   : > { %v2095_v12 = vpop.f32.mrb[15].mxu1 }
 0x748   : > { %v1273_v20 = vpop.f32.mrb[16].mxu1 }
 0x749   : > { %v1274_v21 = vadd.f32 %v1273_v20, %v1228_v17  ;;  %v2106_v22 = vpop.f32.mrb[17].mxu1 }
 0x74a   : > { %v1276_v23 = vpop.f32.mrb[18].mxu1  ;;  %v1442_v22 = vsub.s32 3, %v2946_v16 }
 0x74b   : > { %v1277_v24 = vadd.f32 %v1276_v23, %v1228_v17  ;;  %v2107_v25 = vpop.f32.mrb[19].mxu1  ;;  %v1286_v27 = vsel %vm721_vm2, %v1274_v21, -inf }
 0x74c   : > { %1287 = vmax.xlane.f32.xlu1 %v1286_v27  ;;  %v1443_v25 = vrot.slane %v2950_v18, %v1442_v22  ;;  %v1498_v16 = vrot.slane %v2954_v19, %v1442_v22 }
 0x74d   : > { %v1289_v28 = vsel %vm721_vm2, %v1277_v24, -inf }
 0x74e   : > { %1290 = vmax.xlane.f32.xlu0 %v1289_v28 }
 0x7d9   : > { %v1288_v31 = vpop.xlane.xlu1 %1287 }
 0x7da   : > { %v1292_v32 = vmax.f32 %v1282_v29, %v1288_v31 }
 0x7db   : > { %v1291_v33 = vpop.xlane.xlu0 %1290 }
 0x7dc   : > { %v1294_v34 = vsub.f32 %v1219_v5, %v1292_v32  ;;  %v1300_v35 = vsub.f32 %v1274_v21, %v1292_v32  ;;  %v1293_v36 = vmax.f32 %v1285_v30, %v1291_v33 }
 0x7de   : > { %v1296_v37 = vmul.f32 1.442695, %v1294_v34  ;;  %v1302_v40 = vmul.f32 1.442695, %v1300_v35  ;;  %v1295_v41 = vsub.f32 %v1222_v6, %v1293_v36  ;;  %v1301_v42 = vsub.f32 %v1277_v24, %v1293_v36 }
 0x7e0   : > { %2271 = vpow2.f32 %v1296_v37  ;;  %v1298_v43 = vmul.f32 1.442695, %v1295_v41  ;;  %v1304_v44 = vmul.f32 1.442695, %v1301_v42 }
 0x7e1   : > { %2273 = vpow2.f32 %v1302_v40 }
 0x7e2   : > { %2275 = vpow2.f32 %v1298_v43 }
 0x7e3   : > { %2277 = vpow2.f32 %v1304_v44 }
 0x7ea   : > { %v2272_v45 = vpop.eup %2271 }
 0x7eb   : > { %v2274_v46 = vpop.eup %2273  ;;  %v1306_v47 = vsel %vm721_vm2, %v2272_v45, 0.0 }
 0x7ec   : > { %v2276_v48 = vpop.eup %2275  ;;  %1307 = vadd.xlane.f32.xlu0 %v1306_v47  ;;  %v1312_v53 = vsel %vm721_vm2, %v2274_v46, 0.0 }
 0x7ed   : > { %v2278_v49 = vpop.eup %2277  ;;  %v1322_v50 = vpack.c.bf16 %v2276_v48, %v2272_v45  ;;  %v1309_v52 = vsel %vm721_vm2, %v2276_v48, 0.0 }
 0x7ee   : > { %v1323_v51 = vpack.c.bf16 %v2278_v49, %v2274_v46  ;;  %v1315_v54 = vsel %vm721_vm2, %v2278_v49, 0.0 }
 0x7f0   : > { %1325 = vrot.lane.b32.xlu1 %v1323_v51, %s2546_s7  ;;  %1310 = vadd.xlane.f32.xlu0 %v1309_v52 }
 0x7f4   : > { %1313 = vadd.xlane.f32.xlu0 %v1312_v53  ;;  %1378 = vrot.lane.b32.xlu1 %v2997_v15, %s2548_s18 }
 0x7f8   : > { %1316 = vadd.xlane.f32.xlu0 %v1315_v54  ;;  %1501 = vrot.lane.b32.xlu1 %v2923_v2, %s2549_s25 }
 0x7fc   : > { %1444 = vrot.lane.b32.xlu1 %v2934_v13, %s2549_s25 }
 0x800   : > { %1499 = vrot.lane.b32.xlu1 %v2936_v14, %s2549_s25 }
 0x80e   : > { %1446 = vrot.lane.b32.xlu0 %v2921_v1, %s2549_s25 }
 0x862   : > { %v1326_v55 = vpop.permute.xlu1 %1325 }
 0x863   : > { %v1329_v56 = vsel %vm721_vm2, %v1322_v50, %v1326_v55 }
 0x864   : > { %2113 = vmatmul.mubr.msk.bf16.vlgmr.msra.gmra.mrb[20].mxu0 %vm784_vm3, %v1329_v56 }
 0x865   : > { %2124 = vmatprep.mubr.msk.bf16.mxu0 %vm2545_vm0, %v2544_v0 }
 0x866   : > { %v1379_v57 = vpop.permute.xlu1 %1378 }
 0x867   : > { %2117 = vmatpush3.bf16.msra.mxu1 %v1379_v57 }
 0x868   : > { %2128 = vmatprep.subr.bf16.mxu1 %v2544_v0 }
 0x86a   : > { %v1502_v62 = vpop.permute.xlu1 %1501 }
 0x86b   : > { %v1507_v21 = vsel %vm612_vm1, %v1502_v62, 0 }
 0x86e   : > { %v1445_v63 = vpop.permute.xlu1 %1444 }
 0x879   : > { %v1308_v2 = vpop.xlane.xlu0 %1307 }
 0x87d   : > { %v1311_v13 = vpop.xlane.xlu0 %1310 }
 0x881   : > { %v1314_v58 = vpop.xlane.xlu0 %1313 }
 0x882   : > { %v1318_v59 = vadd.f32 %v1314_v58, %v1308_v2 }
 0x884   : > { %2279 = vrcp.f32 %v1318_v59 }
 0x885   : > { %v1317_v1 = vpop.xlane.xlu0 %1316 }
 0x886   : > { %v1319_v60 = vadd.f32 %v1317_v1, %v1311_v13 }
 0x888   : > { %2281 = vrcp.f32 %v1319_v60 }
 0x889   : > { %v1447_v61 = vpop.permute.xlu0 %1446 }
 0x88a   : > { %v1452_v14 = vsel %vm612_vm1, %v1447_v61, 0 }
 0x88b   : > { %2123 = vmatpush3.bf16.xpose.msra.mxu0 %v1452_v14 }
 0x88c   : > { %2134 = vmatprep.subr.bf16.mxu0 %v2544_v0 }
 0x88e   : > { %v2280_v3 = vpop.eup %2279 }
 0x892   : > { %2125 = vmatmul.mubr.msk.bf16.vlgmr.msra.gmra.mrb[24].mxu0 %vm612_vm1, %v1445_v63  ;;  %v2282_v7 = vpop.eup %2281  ;;  %v2002_v63 = vpack.c.bf16 %v3080_v11, %v3080_v11 }
 0x893   : > { %2135 = vmatpush3.bf16.msra.mxu0 %v2965_v38  ;;  %2138 = vmatprep.mubr.msk.bf16.mxu0 %vm2545_vm0, %v2544_v0 }
 0x894   : > { %2136 = vmatprep.subr.bf16.mxu0 %v2544_v0 }
 0x897   : > { %2137 = vmatpush3.bf16.msra.mxu0 %v2971_v39  ;;  %v1500_v39 = vpop.permute.xlu1 %1499 }
 0x937   : > { %v1366_v4 = vpop.f32.mrb[20].mxu0 }
 0x938   : > { %v1373_v5 = vmul.f32 %v2280_v3, %v1366_v4  ;;  %v2114_v6 = vpop.f32.mrb[21].mxu0 }
 0x939   : > { %v1369_v8 = vpop.f32.mrb[22].mxu0 }
 0x93a   : > { %v1374_v10 = vmul.f32 %v2282_v7, %v1369_v8  ;;  %v2115_v12 = vpop.f32.mrb[23].mxu0  ;;  %v1375_v17 = vadd.f32 %v3011_v26, %v1373_v5 }
 0x93c   : > { %v1376_v38 = vadd.f32 %v3011_v26, %v1374_v10 }
 0x93e   : > { %v1377_v20 = vpack.c.bf16 %v1376_v38, %v1375_v17 }
 0x940   : > { %2119 = vmatmul.mubr.msk.bf16.vlgmr.msra.gmra.mrb[20].mxu1 %vm721_vm2, %v1377_v20 }
 0x941   : > { %2129 = vmatpush3.bf16.xpose.msra.mxu1 %v1507_v21  ;;  %2130 = vmatprep.mubr.msk.bf16.mxu1 %vm2545_vm0, %v2544_v0 }
 0x942   : > { %2142 = vmatprep.subr.bf16.mxu1 %v2544_v0 }
 0x948   : > { %2131 = vmatmul.mubr.msk.bf16.vlgmr.msra.gmra.mrb[24].mxu1 %vm612_vm1, %v1500_v39 }
 0x949   : > { %2144 = vmatprep.mubr.msk.bf16.mxu1 %vm2545_vm0, %v2544_v0 }
 0x965   : > { %v1488_v23 = vpop.f32.mrb[24].mxu0 }
 0x966   : > { %v2126_v24 = vpop.f32.mrb[25].mxu0  ;;  %v1489_v29 = vadd.f32 %v1488_v23, %v1443_v25 }
 0x967   : > { %v1491_v27 = vpop.f32.mrb[26].mxu0 }
 0x968   : > { %v2127_v28 = vpop.f32.mrb[27].mxu0  ;;  %v1492_v30 = vadd.f32 %v1491_v27, %v1443_v25  ;;  %v1550_v31 = vsel %vm721_vm2, %v1489_v29, -inf }
 0x969   : > { %1551 = vmax.xlane.f32.xlu1 %v1550_v31 }
 0x96a   : > { %v1553_v32 = vsel %vm721_vm2, %v1492_v30, -inf }
 0x96b   : > { %1554 = vmax.xlane.f32.xlu0 %v1553_v32 }
 0x9f6   : > { %v1552_v45 = vpop.xlane.xlu1 %1551 }
 0x9f8   : > { %v1555_v46 = vpop.xlane.xlu0 %1554 }
 0xa13   : > { %v1418_v33 = vpop.f32.mrb[20].mxu1 }
 0xa14   : > { %v2120_v34 = vpop.f32.mrb[21].mxu1  ;;  %v2003_v4 = vpack.c.bf16 %v1418_v33, %v1418_v33 }
 0xa15   : > { %v1421_v35 = vpop.f32.mrb[22].mxu1 }
 0xa16   : > { %v2121_v0 = vpop.f32.mrb[23].mxu1  ;;  %v2004_v5 = vpack.c.bf16 %v1421_v35, %v1421_v35 }
 0xa1b   : > { %v1543_v36 = vpop.f32.mrb[24].mxu1 }
 0xa1c   : > { %v1544_v37 = vadd.f32 %v1543_v36, %v1498_v16  ;;  %v2132_v40 = vpop.f32.mrb[25].mxu1 }
 0xa1d   : > { %v1546_v18 = vpop.f32.mrb[26].mxu1 }
 0xa1e   : > { %v1547_v41 = vadd.f32 %v1546_v18, %v1498_v16  ;;  %v2133_v42 = vpop.f32.mrb[27].mxu1  ;;  %v1556_v43 = vsel %vm721_vm2, %v1544_v37, -inf }
 0xa1f   : > { %1557 = vmax.xlane.f32.xlu1 %v1556_v43 }
 0xa20   : > { %v1559_v44 = vsel %vm721_vm2, %v1547_v41, -inf }
 0xa21   : > { %1560 = vmax.xlane.f32.xlu0 %v1559_v44 }
 0xaac   : > { %v1558_v47 = vpop.xlane.xlu1 %1557 }
 0xaad   : > { %v1562_v48 = vmax.f32 %v1552_v45, %v1558_v47 }
 0xaae   : > { %v1561_v49 = vpop.xlane.xlu0 %1560 }
 0xaaf   : > { %v1564_v50 = vsub.f32 %v1489_v29, %v1562_v48  ;;  %v1570_v51 = vsub.f32 %v1544_v37, %v1562_v48  ;;  %v1563_v19 = vmax.f32 %v1555_v46, %v1561_v49 }
 0xab1   : > { %v1566_v52 = vmul.f32 1.442695, %v1564_v50  ;;  %v1572_v53 = vmul.f32 1.442695, %v1570_v51  ;;  %v1565_v54 = vsub.f32 %v1492_v30, %v1563_v19  ;;  %v1571_v55 = vsub.f32 %v1547_v41, %v1563_v19 }
 0xab3   : > { %2283 = vpow2.f32 %v1566_v52  ;;  %v1568_v56 = vmul.f32 1.442695, %v1565_v54  ;;  %v1574_v57 = vmul.f32 1.442695, %v1571_v55 }
 0xab4   : > { %2285 = vpow2.f32 %v1572_v53 }
 0xab5   : > { %2287 = vpow2.f32 %v1568_v56 }
 0xab6   : > { %2289 = vpow2.f32 %v1574_v57 }
 0xabd   : > { %v2284_v2 = vpop.eup %2283 }
 0xabe   : > { %v2286_v13 = vpop.eup %2285  ;;  %v1576_v58 = vsel %vm721_vm2, %v2284_v2, 0.0 }
 0xabf   : > { %v2288_v59 = vpop.eup %2287  ;;  %1577 = vadd.xlane.f32.xlu0 %v1576_v58  ;;  %v1582_v62 = vsel %vm721_vm2, %v2286_v13, 0.0 }
 0xac0   : > { %v2290_v1 = vpop.eup %2289  ;;  %v1592_v60 = vpack.c.bf16 %v2288_v59, %v2284_v2  ;;  %v1579_v14 = vsel %vm721_vm2, %v2288_v59, 0.0 }
 0xac1   : > { %v1593_v61 = vpack.c.bf16 %v2290_v1, %v2286_v13  ;;  %v1585_v3 = vsel %vm721_vm2, %v2290_v1, 0.0 }
 0xac3   : > { %1595 = vrot.lane.b32.xlu1 %v1593_v61, %s2546_s7  ;;  %1580 = vadd.xlane.f32.xlu0 %v1579_v14 }
 0xac7   : > { %1648 = vrot.lane.b32.xlu1 %v2997_v15, %s2549_s25  ;;  %1583 = vadd.xlane.f32.xlu0 %v1582_v62  ;;  %v2001_v15 = vpack.c.bf16 %v3078_v9, %v3078_v9 }
 0xacb   : > { %1163 = vrot.lane.b32.xlu1 %v2002_v63, %s2550_s26  ;;  %1586 = vadd.xlane.f32.xlu0 %v1585_v3 }
 0xacf   : > { %1431 = vrot.lane.b32.xlu1 %v2003_v4, %s2546_s7 }
 0xad3   : > { %1433 = vrot.lane.b32.xlu1 %v2004_v5, %s2546_s7 }
 0xae1   : > { %1161 = vrot.lane.b32.xlu0 %v2001_v15, %s2550_s26 }
 0xb35   : > { %v1596_v6 = vpop.permute.xlu1 %1595 }
 0xb36   : > { %v1599_v11 = vsel %vm721_vm2, %v1592_v60, %v1596_v6 }
 0xb37   : > { %2139 = vmatmul.mubr.msk.bf16.vlgmr.msra.gmra.mrb[28].mxu0 %vm784_vm3, %v1599_v11 }
 0xb39   : > { %v1649_v7 = vpop.permute.xlu1 %1648 }
 0xb3a   : > { %2143 = vmatpush3.bf16.msra.mxu1 %v1649_v7 }
 0xb3d   : > { %v1164_v8 = vpop.permute.xlu1 %1163 }
 0xb3e   : > { %1169 = vst.msk [vmem:[%s3028_s24 + $0x4] sm:$0xf] %vm1167_vm5, %v1164_v8 }
 0xb41   : > { %v1432_v10 = vpop.permute.xlu1 %1431 }
 0xb45   : > { %v1434_v12 = vpop.permute.xlu1 %1433 }
 0xb46   : > { %1439 = vst.msk [vmem:[%s3028_s24 + $0x4] sm:$0xf] %vm1437_vm6, %v1434_v12 }
 0xb4c   : > { %v1578_v17 = vpop.xlane.xlu0 %1577 }
 0xb50   : > { %v1581_v38 = vpop.xlane.xlu0 %1580 }
 0xb54   : > { %v1584_v9 = vpop.xlane.xlu0 %1583 }
 0xb55   : > { %v1588_v20 = vadd.f32 %v1584_v9, %v1578_v17 }
 0xb57   : > { %2291 = vrcp.f32 %v1588_v20 }
 0xb58   : > { %v1587_v21 = vpop.xlane.xlu0 %1586 }
 0xb59   : > { %v1589_v39 = vadd.f32 %v1587_v21, %v1581_v38 }
 0xb5b   : > { %2293 = vrcp.f32 %v1589_v39 }
 0xb5c   : > { %v1162_v22 = vpop.permute.xlu0 %1161 }
 0xb5d   : > { %1168 = vst.msk [vmem:[%s3028_s24] sm:$0xf] %vm1167_vm5, %v1162_v22 }
 0xb5e   : > { %1438 = vst.msk [vmem:[%s3028_s24] sm:$0xf] %vm1437_vm6, %v1432_v10 }
 0xb61   : > { %v2292_v23 = vpop.eup %2291 }
 0xb65   : > { %v2294_v28 = vpop.eup %2293 }
 0xc0a   : > { %v1636_v24 = vpop.f32.mrb[28].mxu0 }
 0xc0b   : > { %v1643_v25 = vmul.f32 %v2292_v23, %v1636_v24  ;;  %v2140_v27 = vpop.f32.mrb[29].mxu0 }
 0xc0c   : > { %v1639_v29 = vpop.f32.mrb[30].mxu0 }
 0xc0d   : > { %v1644_v30 = vmul.f32 %v2294_v28, %v1639_v29  ;;  %v2141_v31 = vpop.f32.mrb[31].mxu0  ;;  %v1645_v32 = vadd.f32 %v3011_v26, %v1643_v25 }
 0xc0f   : > { %v1646_v33 = vadd.f32 %v3011_v26, %v1644_v30 }
 0xc11   : > { %v1647_v34 = vpack.c.bf16 %v1646_v33, %v1645_v32 }
 0xc13   : > { %2145 = vmatmul.mubr.msk.bf16.vlgmr.msra.gmra.mrb[28].mxu1 %vm721_vm2, %v1647_v34 }
 0xce6   : > { %v1688_v35 = vpop.f32.mrb[28].mxu1 }
 0xce7   : > { %v2005_v0 = vpack.c.bf16 %v1688_v35, %v1688_v35  ;;  %v2146_v16 = vpop.f32.mrb[29].mxu1 }
 0xce8   : > { %v1691_v36 = vpop.f32.mrb[30].mxu1 }
 0xce9   : > { %1701 = vrot.lane.b32.xlu1 %v2005_v0, %s2551_s15  ;;  %v2147_v37 = vpop.f32.mrb[31].mxu1  ;;  %v2006_v40 = vpack.c.bf16 %v1691_v36, %v1691_v36 }
 0xced   : > { %1703 = vrot.lane.b32.xlu1 %v2006_v40, %s2551_s15 }
 0xd5b   : > { %v1702_v26 = vpop.permute.xlu1 %1701 }
 0xd5c   : > { %1708 = vst.msk [vmem:[%s3028_s24] sm:$0xf] %vm1707_vm7, %v1702_v26 }
 0xd5f   : > { %v1704_v18 = vpop.permute.xlu1 %1703 }
 0xd60   : > { %1709 = vst.msk [vmem:[%s3028_s24 + $0x4] sm:$0xf] %vm1707_vm7, %v1704_v18 }
 0xd61   : > { %2458 = shalt.err (!%p2455_p8)
}
 0xd62   : > { %s2459_s3 = scalar_lea.hbm %s3158_s20, 128  ;;  %s2463_s1 = scalar_lea.hbm %s3275_s27, 256 }
 0xd63   : > { %p2460_p1 = scmp.ne.s32.totalorder %s3158_s20, %s2459_s3  ;;  %p2464_p6 = scmp.lt.u32.totalorder %s3158_s20, %s3275_s27 }
 0xd64   : > { %p2465_p0 = scmp.lt.u32.totalorder %s2463_s1, %s2459_s3  ;;  %p2467_p2 = scmp.lt.u32.totalorder %s2459_s3, %s3158_s20 }
 0xd65   : > { %p2461_p11 = pnand %p2460_p1, %p3276_p5 }
 0xd66   : > { %p2466_p4 = por %p2465_p0, %p2464_p6 }
 0xd67   : > { %p2462_p13 = pneg %p2461_p11 }
 0xd68   : > { %p2468_p7 = por %p2467_p2, %p2466_p4 }
 0xd6a   : > { %p2469_p3 = pnand %p2468_p7, %p2462_p13 }
 0xd6c   : > { %2472 = shalt.err (!%p2469_p3)
}
 0xd6d   : > { %s2553_s11 = smov 64   ;;  %s2554_s24 = smov 4  }
 0xd6e   : > { %2158 = dma.vmem_to_hbm [thread:$0]  (%p3276_p5), %s3160_s21, 128, %s3158_s20, %s1711_s9, %s2553_s11, %s2553_s11, %s2554_s24  }
 0xd6f PF: > { %s3277_s18 = sld [smem:[#allocation16_spill]]  ;;  %s3278_s25 = sld [smem:[#allocation22_spill]] }
 0xd70   : > { %p3280_p9 = scmp.ge.s32.totalorder %s2535_s14, 2 }
 0xd75   : > { %s1741_s26 = sand.u32 1, %s3277_s18   ;;  %p3279_p10 = scmp.ne.s32.totalorder %s3278_s25, 0 }
 0xd76   : > { %s1742_s15 = scalar_lea.sflag [#allocation4], %s1741_s26 }
 0xd77   : > { %p2177_p12 = pnand %p3280_p9, %p3279_p10 }
 0xd79   : > { %2510 = dma.done.wait (!%p2177_p12), %s1742_s15, 128  }
 0xd7a   : > { %2512 = vsyncadd (!%p2177_p12), %s1742_s15, 4294967168  ;;  %s31_s14 = sadd.s32 1, %s2535_s14   ;;  %s3281_s29 = sld [smem:[#allocation17_spill]] }
 0xd7b   : > { %p28_p8 = scmp.ge.s32.totalorder %s31_s14, 4   ;;  %s3282_s11 = sld [smem:[#allocation21_spill]] }
 0xd7c   : > { %s3283_s12 = sld [smem:[#allocation18_spill]]  ;;  %s3284_s13 = sld [smem:[#allocation19_spill]] }
 0xd7d   : > { %s3285_s30 = smov %s2519_s10  ;;  %30 = sbr.rel (!%p28_p8) target bundleno = 18 (0x12), region = 155 }
 0xd80   : > { %s3286_s10 = smov %s3281_s29 }
 0xd84   :  { %1747 = vsyncpa [#allocation3], 1 }
 0xd85   :  { %1749 = vsyncpa [#allocation3 + $0x1], 1 }
 0xd86   :  { %1750 = vsyncpa [#allocation6], 1 }
 0xd87   :  { %1752 = vsyncpa [#allocation6 + $0x1], 1 }
 0xd88   :  { %1753 = vsyncpa [#allocation9], 1 }
 0xd89   :  { %1755 = vsyncpa [#allocation9 + $0x1], 1 }
 0xd8a   :  { %1756 = vsyncpa [#allocation4], 1 }
 0xd8b   :  { %1758 = vsyncpa [#allocation4 + $0x1], 1 }

</bundles_post_ra>
